<compile_context>
chip_gen: v6e
topology: v6e:2x2x1
jax: 0.10.0
libtpu: 0.0.40
codegen_flags: <defaults>
</compile_context>

<pallas_src>
import functools

import jax
import jax.numpy as jnp
from jax import lax
from jax.experimental import pallas as pl
from jax.experimental.pallas import tpu as pltpu


def _round_up(x, m):
    return (x + m - 1) // m * m


def _vmem_limit(bytes_per_step):
    # Double-buffered pipeline + headroom; floor at 16 MiB, never ask for more
    # than ~127 MiB (v5e/v6e physical); oversize configs need KV tiling anyway.
    need = 2 * bytes_per_step
    return int(min(127 * 1024 * 1024, max(16 * 1024 * 1024, int(1.25 * need))))


# --------------------------------------------------------------------------
# QKV projection: rows tiled, bias-free, three lane-dense outputs (q, k, v).
# --------------------------------------------------------------------------
def _qkv_kernel(x_ref, wq_ref, wk_ref, wv_ref, q_ref, k_ref, v_ref):
    x = x_ref[...]
    q_ref[...] = jnp.dot(x, wq_ref[...],
                         preferred_element_type=jnp.float32).astype(q_ref.dtype)
    k_ref[...] = jnp.dot(x, wk_ref[...],
                         preferred_element_type=jnp.float32).astype(k_ref.dtype)
    v_ref[...] = jnp.dot(x, wv_ref[...],
                         preferred_element_type=jnp.float32).astype(v_ref.dtype)


def _qkv_project(x2d, w_q, w_k, w_v, *, tm_max=256):
    """x2d: [rows, K] -> (q, k, v) each [rows, inner]."""
    rows, K = x2d.shape
    inner = w_q.shape[1]

    if rows <= tm_max:
        tm, rows_pad = rows, rows              # single full-extent block, no pad
    else:
        tm = tm_max
        rows_pad = _round_up(rows, tm)
        x2d = jnp.pad(x2d, ((0, rows_pad - rows), (0, 0)))

    itemsize = jnp.dtype(x2d.dtype).itemsize
    step_bytes = (tm * K + 3 * K * inner + 3 * tm * inner) * itemsize
    cost = pl.CostEstimate(
        flops=2 * rows_pad * K * 3 * inner,
        transcendentals=0,
        bytes_accessed=int((rows_pad * K + 3 * K * inner + 3 * rows_pad * inner)
                           * itemsize),
    )

    outs = pl.pallas_call(
        _qkv_kernel,
        out_shape=tuple(jax.ShapeDtypeStruct((rows_pad, inner), x2d.dtype)
                        for _ in range(3)),
        grid_spec=pltpu.PrefetchScalarGridSpec(
            num_scalar_prefetch=0,
            grid=(rows_pad // tm,),
            in_specs=[
                pl.BlockSpec((tm, K), lambda i: (i, 0)),      # activations
                pl.BlockSpec((K, inner), lambda i: (0, 0)),   # w_q (resident)
                pl.BlockSpec((K, inner), lambda i: (0, 0)),   # w_k (resident)
                pl.BlockSpec((K, inner), lambda i: (0, 0)),   # w_v (resident)
            ],
            out_specs=tuple(pl.BlockSpec((tm, inner), lambda i: (i, 0))
                            for _ in range(3)),
        ),
        compiler_params=pltpu.CompilerParams(
            dimension_semantics=("parallel",),
            vmem_limit_bytes=_vmem_limit(step_bytes),
        ),
        cost_estimate=cost,
    )(x2d, w_q, w_k, w_v)

    q2d, k2d, v2d = outs
    return q2d[:rows], k2d[:rows], v2d[:rows]


# --------------------------------------------------------------------------
# Fused attention:  softmax(Q K^T * scale) [* krd(^T)]  @ V  [@ w_out + b_out]
# One grid step per batch element; all heads handled inside the kernel; the
# output is written once, lane-dense, as (tokens, out_dim).
# The first `mult_rows` query rows get the krd multiplier (transposed when
# transpose_mult); trailing rows (class tokens) are plain softmax.
# --------------------------------------------------------------------------
def _attn_proj_kernel(*refs, heads, dim_head, scale, mult_rows, transpose_mult,
                      nk_valid, project):
    if project:
        q_ref, k_ref, v_ref, krd_ref, wo_ref, bo_ref, o_ref = refs
    else:
        q_ref, k_ref, v_ref, krd_ref, o_ref = refs
        wo_ref = bo_ref = None

    H, d = heads, dim_head
    nq = q_ref.shape[1]
    n_rest = nq - mult_rows

    q_all = q_ref[0]                       # (nq, H*d)
    k_all = k_ref[0, 0:nk_valid, :]        # (nk, H*d) -- skip unused K/V rows
    v_all = v_ref[0, 0:nk_valid, :]

    if project:
        wo = wo_ref[...]                   # (H*d, out_dim), resident
        out_dim = wo.shape[1]
        acc_main = jnp.zeros((mult_rows, out_dim), jnp.float32)
        acc_rest = (jnp.zeros((n_rest, out_dim), jnp.float32)
                    if n_rest > 0 else None)

    for h in range(H):
        lo, hi = h * d, (h + 1) * d
        qh = q_all[:, lo:hi] * scale       # scale the small operand
        kh = k_all[:, lo:hi]
        vh = v_all[:, lo:hi]

        # scores (nq, nk) on the MXU, f32 accumulation
        s = lax.dot_general(qh, kh, (((1,), (1,)), ((), ())),
                            preferred_element_type=jnp.float32)
        s = s - jnp.max(s, axis=-1, keepdims=True)
        p = jnp.exp(s)
        p = p * pl.reciprocal(jnp.sum(p, axis=-1, keepdims=True), approx=True)

        # post-softmax multiplier; in-kernel XLU transpose -> no HBM copy
        mh = krd_ref[0, h].astype(jnp.float32)
        if transpose_mult:
            mh = mh.T
        p_main = p[0:mult_rows, :] * mh
        o_main = jnp.dot(p_main, vh, preferred_element_type=jnp.float32)
        if n_rest > 0:
            o_rest = jnp.dot(p[mult_rows:nq, :], vh,
                             preferred_element_type=jnp.float32)

        if project:
            w_h = wo[lo:hi, :]
            acc_main = acc_main + jnp.dot(o_main, w_h,
                                          preferred_element_type=jnp.float32)
            if n_rest > 0:
                acc_rest = acc_rest + jnp.dot(o_rest, w_h,
                                              preferred_element_type=jnp.float32)
        else:
            o_ref[0, 0:mult_rows, lo:hi] = o_main.astype(o_ref.dtype)
            if n_rest > 0:
                o_ref[0, mult_rows:nq, lo:hi] = o_rest.astype(o_ref.dtype)

    if project:
        bo = bo_ref[...].astype(jnp.float32)
        o_ref[0, 0:mult_rows, :] = (acc_main + bo).astype(o_ref.dtype)
        if n_rest > 0:
            o_ref[0, mult_rows:nq, :] = (acc_rest + bo).astype(o_ref.dtype)


def _attention_project(q, k, v, krd, w_out, b_out, *, heads, dim_head, scale,
                       mult_rows, transpose_mult, nk_valid, project):
    """q: [B,nq,inner], k/v: [B,nk_rows,inner], krd: [B,H,Mk,Nk]."""
    B, nq, inner = q.shape
    nk_rows = k.shape[1]
    _, Hk, Mk, Nk = krd.shape
    out_dim = w_out.shape[1] if project else inner

    in_specs = [
        pl.BlockSpec((1, nq, inner), lambda b: (b, 0, 0)),        # Q (full per b)
        pl.BlockSpec((1, nk_rows, inner), lambda b: (b, 0, 0)),   # K
        pl.BlockSpec((1, nk_rows, inner), lambda b: (b, 0, 0)),   # V
        pl.BlockSpec((1, Hk, Mk, Nk), lambda b: (b, 0, 0, 0)),    # krd
    ]
    args = [q, k, v, krd]
    if project:
        in_specs.append(pl.BlockSpec((inner, out_dim), lambda b: (0, 0)))  # w_out
        in_specs.append(pl.BlockSpec((1, out_dim), lambda b: (0, 0)))      # b_out
        args.append(w_out)
        args.append(b_out.reshape(1, out_dim))

    itemsize = jnp.dtype(q.dtype).itemsize
    step_bytes = (nq * inner + 2 * nk_rows * inner + Hk * Mk * Nk
                  + nq * out_dim) * itemsize
    if project:
        step_bytes += (inner * out_dim + out_dim) * jnp.dtype(w_out.dtype).itemsize

    flops = 4 * B * Hk * nq * nk_valid * dim_head
    if project:
        flops += 2 * B * nq * inner * out_dim
    cost = pl.CostEstimate(
        flops=int(flops),
        transcendentals=int(B * Hk * nq * nk_valid),
        bytes_accessed=int(B * step_bytes),
    )

    kernel = functools.partial(
        _attn_proj_kernel, heads=heads, dim_head=dim_head, scale=scale,
        mult_rows=mult_rows, transpose_mult=transpose_mult,
        nk_valid=nk_valid, project=project)

    return pl.pallas_call(
        kernel,
        out_shape=jax.ShapeDtypeStruct((B, nq, out_dim), q.dtype),
        grid_spec=pltpu.PrefetchScalarGridSpec(
            num_scalar_prefetch=0,
            grid=(B,),
            in_specs=in_specs,
            out_specs=pl.BlockSpec((1, nq, out_dim), lambda b: (b, 0, 0)),
        ),
        compiler_params=pltpu.CompilerParams(
            dimension_semantics=("parallel",),
            vmem_limit_bytes=_vmem_limit(step_bytes),
        ),
        cost_estimate=cost,
    )(*args)


# --------------------------------------------------------------------------
# Full KernelAttention forward.
# --------------------------------------------------------------------------
@functools.partial(jax.jit, static_argnames=("heads", "dim_head", "project_out"))
def kernel_attention(x, kx, clst, krd, w_qkv, w_out, b_out, *, heads, dim_head,
                     project_out):
    B, N, dim = x.shape
    M = kx.shape[1]
    Nc = clst.shape[1]
    inner = heads * dim_head
    scale = dim_head ** (-0.5)
    NA = N + Nc

    w_q, w_k, w_v = jnp.split(w_qkv, 3, axis=1)

    # Token group A = [x ; clst] (contiguous query set for the merged path),
    # token group B = kx.
    tok_a = jnp.concatenate([x, clst], axis=1).reshape(B * NA, dim)
    tok_b = kx.reshape(B * M, dim)

    qa, ka, va = _qkv_project(tok_a, w_q, w_k, w_v)
    qb, kb, vb = _qkv_project(tok_b, w_q, w_k, w_v)
    qa = qa.reshape(B, NA, inner)
    ka = ka.reshape(B, NA, inner)
    va = va.reshape(B, NA, inner)
    qb = qb.reshape(B, M, inner)
    kb = kb.reshape(B, M, inner)
    vb = vb.reshape(B, M, inner)

    # Path A (merged): x-token + class-token queries over kernel-token K/V.
    # First N query rows get the krd^T multiplier; class rows are plain softmax.
    out_a = _attention_project(
        qa, kb, vb, krd, w_out, b_out,
        heads=heads, dim_head=dim_head, scale=scale,
        mult_rows=N, transpose_mult=True, nk_valid=M, project=project_out)

    # Path B: kernel-token queries over x-token K/V (class-token K/V rows are
    # excluded via nk_valid); all rows get the krd multiplier.
    out_b = _attention_project(
        qb, ka, va, krd, w_out, b_out,
        heads=heads, dim_head=dim_head, scale=scale,
        mult_rows=M, transpose_mult=False, nk_valid=N, project=project_out)

    att_out = out_a[:, :N]
    c_out = out_a[:, N:]
    k_out = out_b
    # Dropout(p=0.0) in to_out -> identity.
    return att_out, k_out, c_out


# --------------------------------------------------------------------------
# Pure-JAX reference.
# --------------------------------------------------------------------------
def _reference(x, kx, clst, krd, w_qkv, w_out, b_out, heads, dim_head, project_out):
    B = x.shape[0]
    inner = heads * dim_head
    scale = dim_head ** (-0.5)

    def proj_qkv(t):
        out = t @ w_qkv
        q, k, v = jnp.split(out, 3, axis=-1)

        def r(u):
            return u.reshape(B, u.shape[1], heads, dim_head).transpose(0, 2, 1, 3)

        return r(q), r(k), r(v)

    t_q, t_k, t_v = proj_qkv(x)
    k_q, k_k, k_v = proj_qkv(kx)
    c_q, _, _ = proj_qkv(clst)

    dots = jnp.einsum("bhid,bhjd->bhij", t_q, k_k) * scale
    attn = jax.nn.softmax(dots, axis=-1) * jnp.swapaxes(krd, 2, 3)
    att_out = jnp.einsum("bhij,bhjd->bhid", attn, k_v)

    k_dots = jnp.einsum("bhid,bhjd->bhij", k_q, t_k) * scale
    k_attn = jax.nn.softmax(k_dots, axis=-1) * krd
    k_out = jnp.einsum("bhij,bhjd->bhid", k_attn, t_v)

    c_dots = jnp.einsum("bhid,bhjd->bhij", c_q, k_k) * scale
    c_attn = jax.nn.softmax(c_dots, axis=-1)
    c_out = jnp.einsum("bhij,bhjd->bhid", c_attn, k_v)

    def merge(o):
        return o.transpose(0, 2, 1, 3).reshape(B, o.shape[2], inner)

    outs = [merge(att_out), merge(k_out), merge(c_out)]
    if project_out:
        outs = [o @ w_out + b_out for o in outs]
    return tuple(outs)


if __name__ == "__main__":
    # Small shapes: batch=2, tokens=8, kernel-tokens=16, 1 class token,
    # dim=32, heads=4, dim_head=8 (inner=32, project_out=True).
    B, N, M, Nc = 2, 8, 16, 1
    dim, heads, dim_head = 32, 4, 8
    inner = heads * dim_head
    project_out = not (heads > 0 and dim_head == dim)

    key = jax.random.PRNGKey(0)
    k_x, k_kx, k_c, k_r, k_w1, k_w2, k_b2 = jax.random.split(key, 7)
    x = jax.random.normal(k_x, (B, N, dim), dtype=jnp.float32)
    kx = jax.random.normal(k_kx, (B, M, dim), dtype=jnp.float32)
    clst = jax.random.normal(k_c, (B, Nc, dim), dtype=jnp.float32)
    krd = jax.random.uniform(k_r, (B, heads, M, N), dtype=jnp.float32)
    w_qkv = jax.random.normal(k_w1, (dim, 3 * inner), dtype=jnp.float32) * 0.05
    w_out = jax.random.normal(k_w2, (inner, dim), dtype=jnp.float32) * 0.05
    b_out = jax.random.normal(k_b2, (dim,), dtype=jnp.float32) * 0.05

    outs = kernel_attention(x, kx, clst, krd, w_qkv, w_out, b_out,
                            heads=heads, dim_head=dim_head,
                            project_out=project_out)
    outs = jax.block_until_ready(outs)

    refs = _reference(x, kx, clst, krd, w_qkv, w_out, b_out,
                      heads, dim_head, project_out)

    assert outs[0].shape == (B, N, dim)
    assert outs[1].shape == (B, M, dim)
    assert outs[2].shape == (B, Nc, dim)
    for o, r in zip(outs, refs):
        err = float(jnp.max(jnp.abs(o - r)))
        # tolerance accounts for pl.reciprocal(approx=True) in the softmax
        assert jnp.allclose(o, r, atol=5e-3, rtol=5e-3), f"mismatch {err}"

    print("KERNEL_OK")
</pallas_src>

<mosaic_0001>
module attributes {stable_mosaic.version = 11 : i64} {
  func.func @_qkv_kernel(%arg0: i32, %arg1: memref<18x32xf32, #tpu.memory_space<vmem>>, %arg2: memref<32x32xf32, #tpu.memory_space<vmem>>, %arg3: memref<32x32xf32, #tpu.memory_space<vmem>>, %arg4: memref<32x32xf32, #tpu.memory_space<vmem>>, %arg5: memref<18x32xf32, #tpu.memory_space<vmem>>, %arg6: memref<18x32xf32, #tpu.memory_space<vmem>>, %arg7: memref<18x32xf32, #tpu.memory_space<vmem>>) attributes {dimension_semantics = [#tpu.dimension_semantics<parallel>], iteration_bounds = array<i64: 1>, scalar_prefetch = 0 : i64, scratch_operands = 0 : i64, tpu.core_type = #tpu.core_type<tc>, window_params = [{transform_indices = @transform_0, window_bounds = array<i64: 18, 32>}, {pipeline_mode = #tpu.pipeline_mode<synchronous>, transform_indices = @transform_1, window_bounds = array<i64: 32, 32>}, {pipeline_mode = #tpu.pipeline_mode<synchronous>, transform_indices = @transform_2, window_bounds = array<i64: 32, 32>}, {pipeline_mode = #tpu.pipeline_mode<synchronous>, transform_indices = @transform_3, window_bounds = array<i64: 32, 32>}, {transform_indices = @transform_4, window_bounds = array<i64: 18, 32>}, {transform_indices = @transform_5, window_bounds = array<i64: 18, 32>}, {transform_indices = @transform_6, window_bounds = array<i64: 18, 32>}]} {
    %c0 = arith.constant 0 : index
    %c0_0 = arith.constant 0 : index
    %0 = vector.load %arg1[%c0, %c0_0] : memref<18x32xf32, #tpu.memory_space<vmem>>, vector<18x32xf32>
    %c0_1 = arith.constant 0 : index
    %c0_2 = arith.constant 0 : index
    %1 = vector.load %arg2[%c0_1, %c0_2] : memref<32x32xf32, #tpu.memory_space<vmem>>, vector<32x32xf32>
    %cst = arith.constant dense<0.000000e+00> : vector<18x32xf32>
    %2 = tpu.matmul %0, %1, %cst {dimension_numbers = #tpu.dot_dimension_numbers<[1], [0], [0], [1], [0, 0, 1, 1], [], []>} : vector<18x32xf32>, vector<32x32xf32>, vector<18x32xf32> -> vector<18x32xf32>
    %c0_3 = arith.constant 0 : index
    %c0_4 = arith.constant 0 : index
    %3 = vector.load %arg5[%c0_3, %c0_4] : memref<18x32xf32, #tpu.memory_space<vmem>>, vector<18x32xf32>
    tpu.vector_store %arg5[%c0_3, %c0_4], %2 {strides = array<i32>} : memref<18x32xf32, #tpu.memory_space<vmem>>, vector<18x32xf32>,
    %c0_5 = arith.constant 0 : index
    %c0_6 = arith.constant 0 : index
    %4 = vector.load %arg3[%c0_5, %c0_6] : memref<32x32xf32, #tpu.memory_space<vmem>>, vector<32x32xf32>
    %cst_7 = arith.constant dense<0.000000e+00> : vector<18x32xf32>
    %5 = tpu.matmul %0, %4, %cst_7 {dimension_numbers = #tpu.dot_dimension_numbers<[1], [0], [0], [1], [0, 0, 1, 1], [], []>} : vector<18x32xf32>, vector<32x32xf32>, vector<18x32xf32> -> vector<18x32xf32>
    %c0_8 = arith.constant 0 : index
    %c0_9 = arith.constant 0 : index
    %6 = vector.load %arg6[%c0_8, %c0_9] : memref<18x32xf32, #tpu.memory_space<vmem>>, vector<18x32xf32>
    tpu.vector_store %arg6[%c0_8, %c0_9], %5 {strides = array<i32>} : memref<18x32xf32, #tpu.memory_space<vmem>>, vector<18x32xf32>,
    %c0_10 = arith.constant 0 : index
    %c0_11 = arith.constant 0 : index
    %7 = vector.load %arg4[%c0_10, %c0_11] : memref<32x32xf32, #tpu.memory_space<vmem>>, vector<32x32xf32>
    %cst_12 = arith.constant dense<0.000000e+00> : vector<18x32xf32>
    %8 = tpu.matmul %0, %7, %cst_12 {dimension_numbers = #tpu.dot_dimension_numbers<[1], [0], [0], [1], [0, 0, 1, 1], [], []>} : vector<18x32xf32>, vector<32x32xf32>, vector<18x32xf32> -> vector<18x32xf32>
    %c0_13 = arith.constant 0 : index
    %c0_14 = arith.constant 0 : index
    %9 = vector.load %arg7[%c0_13, %c0_14] : memref<18x32xf32, #tpu.memory_space<vmem>>, vector<18x32xf32>
    tpu.vector_store %arg7[%c0_13, %c0_14], %8 {strides = array<i32>} : memref<18x32xf32, #tpu.memory_space<vmem>>, vector<18x32xf32>,
    return
  }
  func.func @transform_0(%arg0: i32) -> (i32, i32) {
    %c0_i32 = arith.constant 0 : i32
    %c0_i32_0 = arith.constant 0 : i32
    return %arg0, %c0_i32 : i32, i32
  }
  func.func @transform_1(%arg0: i32) -> (i32, i32) {
    %c0_i32 = arith.constant 0 : i32
    %c0_i32_0 = arith.constant 0 : i32
    %c0_i32_1 = arith.constant 0 : i32
    return %c0_i32, %c0_i32_0 : i32, i32
  }
  func.func @transform_2(%arg0: i32) -> (i32, i32) {
    %c0_i32 = arith.constant 0 : i32
    %c0_i32_0 = arith.constant 0 : i32
    %c0_i32_1 = arith.constant 0 : i32
    return %c0_i32, %c0_i32_0 : i32, i32
  }
  func.func @transform_3(%arg0: i32) -> (i32, i32) {
    %c0_i32 = arith.constant 0 : i32
    %c0_i32_0 = arith.constant 0 : i32
    %c0_i32_1 = arith.constant 0 : i32
    return %c0_i32, %c0_i32_0 : i32, i32
  }
  func.func @transform_4(%arg0: i32) -> (i32, i32) {
    %c0_i32 = arith.constant 0 : i32
    %c0_i32_0 = arith.constant 0 : i32
    return %arg0, %c0_i32 : i32, i32
  }
  func.func @transform_5(%arg0: i32) -> (i32, i32) {
    %c0_i32 = arith.constant 0 : i32
    %c0_i32_0 = arith.constant 0 : i32
    return %arg0, %c0_i32 : i32, i32
  }
  func.func @transform_6(%arg0: i32) -> (i32, i32) {
    %c0_i32 = arith.constant 0 : i32
    %c0_i32_0 = arith.constant 0 : i32
    return %arg0, %c0_i32 : i32, i32
  }
}

module attributes {stable_mosaic.version = 11 : i64} {
  func.func @_qkv_kernel(%arg0: i32, %arg1: memref<32x32xf32, #tpu.memory_space<vmem>>, %arg2: memref<32x32xf32, #tpu.memory_space<vmem>>, %arg3: memref<32x32xf32, #tpu.memory_space<vmem>>, %arg4: memref<32x32xf32, #tpu.memory_space<vmem>>, %arg5: memref<32x32xf32, #tpu.memory_space<vmem>>, %arg6: memref<32x32xf32, #tpu.memory_space<vmem>>, %arg7: memref<32x32xf32, #tpu.memory_space<vmem>>) attributes {dimension_semantics = [#tpu.dimension_semantics<parallel>], iteration_bounds = array<i64: 1>, scalar_prefetch = 0 : i64, scratch_operands = 0 : i64, tpu.core_type = #tpu.core_type<tc>, window_params = [{transform_indices = @transform_0, window_bounds = array<i64: 32, 32>}, {pipeline_mode = #tpu.pipeline_mode<synchronous>, transform_indices = @transform_1, window_bounds = array<i64: 32, 32>}, {pipeline_mode = #tpu.pipeline_mode<synchronous>, transform_indices = @transform_2, window_bounds = array<i64: 32, 32>}, {pipeline_mode = #tpu.pipeline_mode<synchronous>, transform_indices = @transform_3, window_bounds = array<i64: 32, 32>}, {transform_indices = @transform_4, window_bounds = array<i64: 32, 32>}, {transform_indices = @transform_5, window_bounds = array<i64: 32, 32>}, {transform_indices = @transform_6, window_bounds = array<i64: 32, 32>}]} {
    %c0 = arith.constant 0 : index
    %c0_0 = arith.constant 0 : index
    %0 = vector.load %arg1[%c0, %c0_0] : memref<32x32xf32, #tpu.memory_space<vmem>>, vector<32x32xf32>
    %c0_1 = arith.constant 0 : index
    %c0_2 = arith.constant 0 : index
    %1 = vector.load %arg2[%c0_1, %c0_2] : memref<32x32xf32, #tpu.memory_space<vmem>>, vector<32x32xf32>
    %cst = arith.constant dense<0.000000e+00> : vector<32x32xf32>
    %2 = tpu.matmul %0, %1, %cst {dimension_numbers = #tpu.dot_dimension_numbers<[1], [0], [0], [1], [0, 0, 1, 1], [], []>} : vector<32x32xf32>, vector<32x32xf32>, vector<32x32xf32> -> vector<32x32xf32>
    %c0_3 = arith.constant 0 : index
    %c0_4 = arith.constant 0 : index
    %3 = vector.load %arg5[%c0_3, %c0_4] : memref<32x32xf32, #tpu.memory_space<vmem>>, vector<32x32xf32>
    tpu.vector_store %arg5[%c0_3, %c0_4], %2 {strides = array<i32>} : memref<32x32xf32, #tpu.memory_space<vmem>>, vector<32x32xf32>,
    %c0_5 = arith.constant 0 : index
    %c0_6 = arith.constant 0 : index
    %4 = vector.load %arg3[%c0_5, %c0_6] : memref<32x32xf32, #tpu.memory_space<vmem>>, vector<32x32xf32>
    %cst_7 = arith.constant dense<0.000000e+00> : vector<32x32xf32>
    %5 = tpu.matmul %0, %4, %cst_7 {dimension_numbers = #tpu.dot_dimension_numbers<[1], [0], [0], [1], [0, 0, 1, 1], [], []>} : vector<32x32xf32>, vector<32x32xf32>, vector<32x32xf32> -> vector<32x32xf32>
    %c0_8 = arith.constant 0 : index
    %c0_9 = arith.constant 0 : index
    %6 = vector.load %arg6[%c0_8, %c0_9] : memref<32x32xf32, #tpu.memory_space<vmem>>, vector<32x32xf32>
    tpu.vector_store %arg6[%c0_8, %c0_9], %5 {strides = array<i32>} : memref<32x32xf32, #tpu.memory_space<vmem>>, vector<32x32xf32>,
    %c0_10 = arith.constant 0 : index
    %c0_11 = arith.constant 0 : index
    %7 = vector.load %arg4[%c0_10, %c0_11] : memref<32x32xf32, #tpu.memory_space<vmem>>, vector<32x32xf32>
    %cst_12 = arith.constant dense<0.000000e+00> : vector<32x32xf32>
    %8 = tpu.matmul %0, %7, %cst_12 {dimension_numbers = #tpu.dot_dimension_numbers<[1], [0], [0], [1], [0, 0, 1, 1], [], []>} : vector<32x32xf32>, vector<32x32xf32>, vector<32x32xf32> -> vector<32x32xf32>
    %c0_13 = arith.constant 0 : index
    %c0_14 = arith.constant 0 : index
    %9 = vector.load %arg7[%c0_13, %c0_14] : memref<32x32xf32, #tpu.memory_space<vmem>>, vector<32x32xf32>
    tpu.vector_store %arg7[%c0_13, %c0_14], %8 {strides = array<i32>} : memref<32x32xf32, #tpu.memory_space<vmem>>, vector<32x32xf32>,
    return
  }
  func.func @transform_0(%arg0: i32) -> (i32, i32) {
    %c0_i32 = arith.constant 0 : i32
    %c0_i32_0 = arith.constant 0 : i32
    return %arg0, %c0_i32 : i32, i32
  }
  func.func @transform_1(%arg0: i32) -> (i32, i32) {
    %c0_i32 = arith.constant 0 : i32
    %c0_i32_0 = arith.constant 0 : i32
    %c0_i32_1 = arith.constant 0 : i32
    return %c0_i32, %c0_i32_0 : i32, i32
  }
  func.func @transform_2(%arg0: i32) -> (i32, i32) {
    %c0_i32 = arith.constant 0 : i32
    %c0_i32_0 = arith.constant 0 : i32
    %c0_i32_1 = arith.constant 0 : i32
    return %c0_i32, %c0_i32_0 : i32, i32
  }
  func.func @transform_3(%arg0: i32) -> (i32, i32) {
    %c0_i32 = arith.constant 0 : i32
    %c0_i32_0 = arith.constant 0 : i32
    %c0_i32_1 = arith.constant 0 : i32
    return %c0_i32, %c0_i32_0 : i32, i32
  }
  func.func @transform_4(%arg0: i32) -> (i32, i32) {
    %c0_i32 = arith.constant 0 : i32
    %c0_i32_0 = arith.constant 0 : i32
    return %arg0, %c0_i32 : i32, i32
  }
  func.func @transform_5(%arg0: i32) -> (i32, i32) {
    %c0_i32 = arith.constant 0 : i32
    %c0_i32_0 = arith.constant 0 : i32
    return %arg0, %c0_i32 : i32, i32
  }
  func.func @transform_6(%arg0: i32) -> (i32, i32) {
    %c0_i32 = arith.constant 0 : i32
    %c0_i32_0 = arith.constant 0 : i32
    return %arg0, %c0_i32 : i32, i32
  }
}

module attributes {stable_mosaic.version = 11 : i64} {
  func.func @_attn_proj_kernel(%arg0: i32, %arg1: memref<1x16x32xf32, #tpu.memory_space<vmem>>, %arg2: memref<1x9x32xf32, #tpu.memory_space<vmem>>, %arg3: memref<1x9x32xf32, #tpu.memory_space<vmem>>, %arg4: memref<1x4x16x8xf32, #tpu.memory_space<vmem>>, %arg5: memref<32x32xf32, #tpu.memory_space<vmem>>, %arg6: memref<1x32xf32, #tpu.memory_space<vmem>>, %arg7: memref<1x16x32xf32, #tpu.memory_space<vmem>>) attributes {dimension_semantics = [#tpu.dimension_semantics<parallel>], iteration_bounds = array<i64: 2>, scalar_prefetch = 0 : i64, scratch_operands = 0 : i64, tpu.core_type = #tpu.core_type<tc>, window_params = [{transform_indices = @transform_0, window_bounds = array<i64: 1, 16, 32>}, {transform_indices = @transform_1, window_bounds = array<i64: 1, 9, 32>}, {transform_indices = @transform_2, window_bounds = array<i64: 1, 9, 32>}, {transform_indices = @transform_3, window_bounds = array<i64: 1, 4, 16, 8>}, {pipeline_mode = #tpu.pipeline_mode<synchronous>, transform_indices = @transform_4, window_bounds = array<i64: 32, 32>}, {pipeline_mode = #tpu.pipeline_mode<synchronous>, transform_indices = @transform_5, window_bounds = array<i64: 1, 32>}, {transform_indices = @transform_6, window_bounds = array<i64: 1, 16, 32>}]} {
    %c0 = arith.constant 0 : index
    %c0_0 = arith.constant 0 : index
    %c0_1 = arith.constant 0 : index
    %0 = vector.load %arg1[%c0, %c0_0, %c0_1] : memref<1x16x32xf32, #tpu.memory_space<vmem>>, vector<1x16x32xf32>
    %1 = vector.shape_cast %0 : vector<1x16x32xf32> to vector<16x32xf32>
    %c0_2 = arith.constant 0 : index
    %c0_3 = arith.constant 0 : index
    %c0_4 = arith.constant 0 : index
    %2 = vector.load %arg2[%c0_2, %c0_3, %c0_4] : memref<1x9x32xf32, #tpu.memory_space<vmem>>, vector<1x8x32xf32>
    %3 = vector.shape_cast %2 : vector<1x8x32xf32> to vector<8x32xf32>
    %c0_5 = arith.constant 0 : index
    %c0_6 = arith.constant 0 : index
    %c0_7 = arith.constant 0 : index
    %4 = vector.load %arg3[%c0_5, %c0_6, %c0_7] : memref<1x9x32xf32, #tpu.memory_space<vmem>>, vector<1x8x32xf32>
    %5 = vector.shape_cast %4 : vector<1x8x32xf32> to vector<8x32xf32>
    %c0_8 = arith.constant 0 : index
    %c0_9 = arith.constant 0 : index
    %6 = vector.load %arg5[%c0_8, %c0_9] : memref<32x32xf32, #tpu.memory_space<vmem>>, vector<32x32xf32>
    %cst = arith.constant 0.000000e+00 : f32
    %7 = vector.broadcast %cst : f32 to vector<16x32xf32>
    %8 = vector.extract_strided_slice %1 {offsets = [0, 0], sizes = [16, 8], strides = [1, 1]} : vector<16x32xf32> to vector<16x8xf32>
    %cst_10 = arith.constant 0.353553385 : f32
    %9 = vector.broadcast %cst_10 : f32 to vector<16x8xf32>
    %10 = arith.mulf %8, %9 : vector<16x8xf32>
    %11 = vector.extract_strided_slice %3 {offsets = [0, 0], sizes = [8, 8], strides = [1, 1]} : vector<8x32xf32> to vector<8x8xf32>
    %12 = vector.extract_strided_slice %5 {offsets = [0, 0], sizes = [8, 8], strides = [1, 1]} : vector<8x32xf32> to vector<8x8xf32>
    %cst_11 = arith.constant dense<0.000000e+00> : vector<16x8xf32>
    %13 = tpu.matmul %10, %11, %cst_11 {dimension_numbers = #tpu.dot_dimension_numbers<[1], [1], [0], [0], [0, 0, 1, 0], [], []>} : vector<16x8xf32>, vector<8x8xf32>, vector<16x8xf32> -> vector<16x8xf32>
    %cst_12 = arith.constant dense<0xFF800000> : vector<16xf32>
    %14 = vector.multi_reduction <maximumf>, %13, %cst_12 [1] : vector<16x8xf32> to vector<16xf32>
    %15 = vector.shape_cast %14 : vector<16xf32> to vector<16x1xf32>
    %16 = vector.broadcast %15 : vector<16x1xf32> to vector<16x8xf32>
    %17 = arith.subf %13, %16 : vector<16x8xf32>
    %18 = math.exp %17 : vector<16x8xf32>
    %cst_13 = arith.constant dense<0.000000e+00> : vector<16xf32>
    %19 = vector.multi_reduction <add>, %18, %cst_13 [1] : vector<16x8xf32> to vector<16xf32>
    %20 = vector.shape_cast %19 : vector<16xf32> to vector<16x1xf32>
    %21 = tpu.reciprocal %20 {approx = true} : vector<16x1xf32> -> vector<16x1xf32>
    %22 = vector.broadcast %21 : vector<16x1xf32> to vector<16x8xf32>
    %23 = arith.mulf %18, %22 : vector<16x8xf32>
    %c0_14 = arith.constant 0 : index
    %c0_15 = arith.constant 0 : index
    %c0_16 = arith.constant 0 : index
    %c0_17 = arith.constant 0 : index
    %24 = vector.load %arg4[%c0_14, %c0_15, %c0_16, %c0_17] : memref<1x4x16x8xf32, #tpu.memory_space<vmem>>, vector<1x1x16x8xf32>
    %25 = vector.shape_cast %24 : vector<1x1x16x8xf32> to vector<16x8xf32>
    %26 = arith.mulf %23, %25 : vector<16x8xf32>
    %cst_18 = arith.constant dense<0.000000e+00> : vector<16x8xf32>
    %27 = tpu.matmul %26, %12, %cst_18 {dimension_numbers = #tpu.dot_dimension_numbers<[1], [0], [0], [1], [0, 0, 1, 1], [], []>} : vector<16x8xf32>, vector<8x8xf32>, vector<16x8xf32> -> vector<16x8xf32>
    %28 = vector.extract_strided_slice %6 {offsets = [0, 0], sizes = [8, 32], strides = [1, 1]} : vector<32x32xf32> to vector<8x32xf32>
    %cst_19 = arith.constant dense<0.000000e+00> : vector<16x32xf32>
    %29 = tpu.matmul %27, %28, %cst_19 {dimension_numbers = #tpu.dot_dimension_numbers<[1], [0], [0], [1], [0, 0, 1, 1], [], []>} : vector<16x8xf32>, vector<8x32xf32>, vector<16x32xf32> -> vector<16x32xf32>
    %30 = arith.addf %7, %29 : vector<16x32xf32>
    %31 = vector.extract_strided_slice %1 {offsets = [0, 8], sizes = [16, 8], strides = [1, 1]} : vector<16x32xf32> to vector<16x8xf32>
    %cst_20 = arith.constant 0.353553385 : f32
    %32 = vector.broadcast %cst_20 : f32 to vector<16x8xf32>
    %33 = arith.mulf %31, %32 : vector<16x8xf32>
    %34 = vector.extract_strided_slice %3 {offsets = [0, 8], sizes = [8, 8], strides = [1, 1]} : vector<8x32xf32> to vector<8x8xf32>
    %35 = vector.extract_strided_slice %5 {offsets = [0, 8], sizes = [8, 8], strides = [1, 1]} : vector<8x32xf32> to vector<8x8xf32>
    %cst_21 = arith.constant dense<0.000000e+00> : vector<16x8xf32>
    %36 = tpu.matmul %33, %34, %cst_21 {dimension_numbers = #tpu.dot_dimension_numbers<[1], [1], [0], [0], [0, 0, 1, 0], [], []>} : vector<16x8xf32>, vector<8x8xf32>, vector<16x8xf32> -> vector<16x8xf32>
    %cst_22 = arith.constant dense<0xFF800000> : vector<16xf32>
    %37 = vector.multi_reduction <maximumf>, %36, %cst_22 [1] : vector<16x8xf32> to vector<16xf32>
    %38 = vector.shape_cast %37 : vector<16xf32> to vector<16x1xf32>
    %39 = vector.broadcast %38 : vector<16x1xf32> to vector<16x8xf32>
    %40 = arith.subf %36, %39 : vector<16x8xf32>
    %41 = math.exp %40 : vector<16x8xf32>
    %cst_23 = arith.constant dense<0.000000e+00> : vector<16xf32>
    %42 = vector.multi_reduction <add>, %41, %cst_23 [1] : vector<16x8xf32> to vector<16xf32>
    %43 = vector.shape_cast %42 : vector<16xf32> to vector<16x1xf32>
    %44 = tpu.reciprocal %43 {approx = true} : vector<16x1xf32> -> vector<16x1xf32>
    %45 = vector.broadcast %44 : vector<16x1xf32> to vector<16x8xf32>
    %46 = arith.mulf %41, %45 : vector<16x8xf32>
    %c0_24 = arith.constant 0 : index
    %c1 = arith.constant 1 : index
    %c0_25 = arith.constant 0 : index
    %c0_26 = arith.constant 0 : index
    %47 = vector.load %arg4[%c0_24, %c1, %c0_25, %c0_26] : memref<1x4x16x8xf32, #tpu.memory_space<vmem>>, vector<1x1x16x8xf32>
    %48 = vector.shape_cast %47 : vector<1x1x16x8xf32> to vector<16x8xf32>
    %49 = arith.mulf %46, %48 : vector<16x8xf32>
    %cst_27 = arith.constant dense<0.000000e+00> : vector<16x8xf32>
    %50 = tpu.matmul %49, %35, %cst_27 {dimension_numbers = #tpu.dot_dimension_numbers<[1], [0], [0], [1], [0, 0, 1, 1], [], []>} : vector<16x8xf32>, vector<8x8xf32>, vector<16x8xf32> -> vector<16x8xf32>
    %51 = vector.extract_strided_slice %6 {offsets = [8, 0], sizes = [8, 32], strides = [1, 1]} : vector<32x32xf32> to vector<8x32xf32>
    %cst_28 = arith.constant dense<0.000000e+00> : vector<16x32xf32>
    %52 = tpu.matmul %50, %51, %cst_28 {dimension_numbers = #tpu.dot_dimension_numbers<[1], [0], [0], [1], [0, 0, 1, 1], [], []>} : vector<16x8xf32>, vector<8x32xf32>, vector<16x32xf32> -> vector<16x32xf32>
    %53 = arith.addf %30, %52 : vector<16x32xf32>
    %54 = vector.extract_strided_slice %1 {offsets = [0, 16], sizes = [16, 8], strides = [1, 1]} : vector<16x32xf32> to vector<16x8xf32>
    %cst_29 = arith.constant 0.353553385 : f32
    %55 = vector.broadcast %cst_29 : f32 to vector<16x8xf32>
    %56 = arith.mulf %54, %55 : vector<16x8xf32>
    %57 = vector.extract_strided_slice %3 {offsets = [0, 16], sizes = [8, 8], strides = [1, 1]} : vector<8x32xf32> to vector<8x8xf32>
    %58 = vector.extract_strided_slice %5 {offsets = [0, 16], sizes = [8, 8], strides = [1, 1]} : vector<8x32xf32> to vector<8x8xf32>
    %cst_30 = arith.constant dense<0.000000e+00> : vector<16x8xf32>
    %59 = tpu.matmul %56, %57, %cst_30 {dimension_numbers = #tpu.dot_dimension_numbers<[1], [1], [0], [0], [0, 0, 1, 0], [], []>} : vector<16x8xf32>, vector<8x8xf32>, vector<16x8xf32> -> vector<16x8xf32>
    %cst_31 = arith.constant dense<0xFF800000> : vector<16xf32>
    %60 = vector.multi_reduction <maximumf>, %59, %cst_31 [1] : vector<16x8xf32> to vector<16xf32>
    %61 = vector.shape_cast %60 : vector<16xf32> to vector<16x1xf32>
    %62 = vector.broadcast %61 : vector<16x1xf32> to vector<16x8xf32>
    %63 = arith.subf %59, %62 : vector<16x8xf32>
    %64 = math.exp %63 : vector<16x8xf32>
    %cst_32 = arith.constant dense<0.000000e+00> : vector<16xf32>
    %65 = vector.multi_reduction <add>, %64, %cst_32 [1] : vector<16x8xf32> to vector<16xf32>
    %66 = vector.shape_cast %65 : vector<16xf32> to vector<16x1xf32>
    %67 = tpu.reciprocal %66 {approx = true} : vector<16x1xf32> -> vector<16x1xf32>
    %68 = vector.broadcast %67 : vector<16x1xf32> to vector<16x8xf32>
    %69 = arith.mulf %64, %68 : vector<16x8xf32>
    %c0_33 = arith.constant 0 : index
    %c2 = arith.constant 2 : index
    %c0_34 = arith.constant 0 : index
    %c0_35 = arith.constant 0 : index
    %70 = vector.load %arg4[%c0_33, %c2, %c0_34, %c0_35] : memref<1x4x16x8xf32, #tpu.memory_space<vmem>>, vector<1x1x16x8xf32>
    %71 = vector.shape_cast %70 : vector<1x1x16x8xf32> to vector<16x8xf32>
    %72 = arith.mulf %69, %71 : vector<16x8xf32>
    %cst_36 = arith.constant dense<0.000000e+00> : vector<16x8xf32>
    %73 = tpu.matmul %72, %58, %cst_36 {dimension_numbers = #tpu.dot_dimension_numbers<[1], [0], [0], [1], [0, 0, 1, 1], [], []>} : vector<16x8xf32>, vector<8x8xf32>, vector<16x8xf32> -> vector<16x8xf32>
    %74 = vector.extract_strided_slice %6 {offsets = [16, 0], sizes = [8, 32], strides = [1, 1]} : vector<32x32xf32> to vector<8x32xf32>
    %cst_37 = arith.constant dense<0.000000e+00> : vector<16x32xf32>
    %75 = tpu.matmul %73, %74, %cst_37 {dimension_numbers = #tpu.dot_dimension_numbers<[1], [0], [0], [1], [0, 0, 1, 1], [], []>} : vector<16x8xf32>, vector<8x32xf32>, vector<16x32xf32> -> vector<16x32xf32>
    %76 = arith.addf %53, %75 : vector<16x32xf32>
    %77 = vector.extract_strided_slice %1 {offsets = [0, 24], sizes = [16, 8], strides = [1, 1]} : vector<16x32xf32> to vector<16x8xf32>
    %cst_38 = arith.constant 0.353553385 : f32
    %78 = vector.broadcast %cst_38 : f32 to vector<16x8xf32>
    %79 = arith.mulf %77, %78 : vector<16x8xf32>
    %80 = vector.extract_strided_slice %3 {offsets = [0, 24], sizes = [8, 8], strides = [1, 1]} : vector<8x32xf32> to vector<8x8xf32>
    %81 = vector.extract_strided_slice %5 {offsets = [0, 24], sizes = [8, 8], strides = [1, 1]} : vector<8x32xf32> to vector<8x8xf32>
    %cst_39 = arith.constant dense<0.000000e+00> : vector<16x8xf32>
    %82 = tpu.matmul %79, %80, %cst_39 {dimension_numbers = #tpu.dot_dimension_numbers<[1], [1], [0], [0], [0, 0, 1, 0], [], []>} : vector<16x8xf32>, vector<8x8xf32>, vector<16x8xf32> -> vector<16x8xf32>
    %cst_40 = arith.constant dense<0xFF800000> : vector<16xf32>
    %83 = vector.multi_reduction <maximumf>, %82, %cst_40 [1] : vector<16x8xf32> to vector<16xf32>
    %84 = vector.shape_cast %83 : vector<16xf32> to vector<16x1xf32>
    %85 = vector.broadcast %84 : vector<16x1xf32> to vector<16x8xf32>
    %86 = arith.subf %82, %85 : vector<16x8xf32>
    %87 = math.exp %86 : vector<16x8xf32>
    %cst_41 = arith.constant dense<0.000000e+00> : vector<16xf32>
    %88 = vector.multi_reduction <add>, %87, %cst_41 [1] : vector<16x8xf32> to vector<16xf32>
    %89 = vector.shape_cast %88 : vector<16xf32> to vector<16x1xf32>
    %90 = tpu.reciprocal %89 {approx = true} : vector<16x1xf32> -> vector<16x1xf32>
    %91 = vector.broadcast %90 : vector<16x1xf32> to vector<16x8xf32>
    %92 = arith.mulf %87, %91 : vector<16x8xf32>
    %c0_42 = arith.constant 0 : index
    %c3 = arith.constant 3 : index
    %c0_43 = arith.constant 0 : index
    %c0_44 = arith.constant 0 : index
    %93 = vector.load %arg4[%c0_42, %c3, %c0_43, %c0_44] : memref<1x4x16x8xf32, #tpu.memory_space<vmem>>, vector<1x1x16x8xf32>
    %94 = vector.shape_cast %93 : vector<1x1x16x8xf32> to vector<16x8xf32>
    %95 = arith.mulf %92, %94 : vector<16x8xf32>
    %cst_45 = arith.constant dense<0.000000e+00> : vector<16x8xf32>
    %96 = tpu.matmul %95, %81, %cst_45 {dimension_numbers = #tpu.dot_dimension_numbers<[1], [0], [0], [1], [0, 0, 1, 1], [], []>} : vector<16x8xf32>, vector<8x8xf32>, vector<16x8xf32> -> vector<16x8xf32>
    %97 = vector.extract_strided_slice %6 {offsets = [24, 0], sizes = [8, 32], strides = [1, 1]} : vector<32x32xf32> to vector<8x32xf32>
    %cst_46 = arith.constant dense<0.000000e+00> : vector<16x32xf32>
    %98 = tpu.matmul %96, %97, %cst_46 {dimension_numbers = #tpu.dot_dimension_numbers<[1], [0], [0], [1], [0, 0, 1, 1], [], []>} : vector<16x8xf32>, vector<8x32xf32>, vector<16x32xf32> -> vector<16x32xf32>
    %99 = arith.addf %76, %98 : vector<16x32xf32>
    %c0_47 = arith.constant 0 : index
    %c0_48 = arith.constant 0 : index
    %100 = vector.load %arg6[%c0_47, %c0_48] : memref<1x32xf32, #tpu.memory_space<vmem>>, vector<1x32xf32>
    %101 = vector.broadcast %100 : vector<1x32xf32> to vector<16x32xf32>
    %102 = arith.addf %99, %101 : vector<16x32xf32>
    %c0_49 = arith.constant 0 : index
    %c0_50 = arith.constant 0 : index
    %c0_51 = arith.constant 0 : index
    %103 = vector.load %arg7[%c0_49, %c0_50, %c0_51] : memref<1x16x32xf32, #tpu.memory_space<vmem>>, vector<1x16x32xf32>
    %104 = vector.shape_cast %103 : vector<1x16x32xf32> to vector<16x32xf32>
    %105 = vector.shape_cast %102 : vector<16x32xf32> to vector<1x16x32xf32>
    tpu.vector_store %arg7[%c0_49, %c0_50, %c0_51], %105 {strides = array<i32>} : memref<1x16x32xf32, #tpu.memory_space<vmem>>, vector<1x16x32xf32>,
    return
  }
  func.func @transform_0(%arg0: i32) -> (i32, i32, i32) {
    %c0_i32 = arith.constant 0 : i32
    %c0_i32_0 = arith.constant 0 : i32
    %c0_i32_1 = arith.constant 0 : i32
    return %arg0, %c0_i32, %c0_i32_0 : i32, i32, i32
  }
  func.func @transform_1(%arg0: i32) -> (i32, i32, i32) {
    %c0_i32 = arith.constant 0 : i32
    %c0_i32_0 = arith.constant 0 : i32
    %c0_i32_1 = arith.constant 0 : i32
    return %arg0, %c0_i32, %c0_i32_0 : i32, i32, i32
  }
  func.func @transform_2(%arg0: i32) -> (i32, i32, i32) {
    %c0_i32 = arith.constant 0 : i32
    %c0_i32_0 = arith.constant 0 : i32
    %c0_i32_1 = arith.constant 0 : i32
    return %arg0, %c0_i32, %c0_i32_0 : i32, i32, i32
  }
  func.func @transform_3(%arg0: i32) -> (i32, i32, i32, i32) {
    %c0_i32 = arith.constant 0 : i32
    %c0_i32_0 = arith.constant 0 : i32
    %c0_i32_1 = arith.constant 0 : i32
    %c0_i32_2 = arith.constant 0 : i32
    return %arg0, %c0_i32, %c0_i32_0, %c0_i32_1 : i32, i32, i32, i32
  }
  func.func @transform_4(%arg0: i32) -> (i32, i32) {
    %c0_i32 = arith.constant 0 : i32
    %c0_i32_0 = arith.constant 0 : i32
    %c0_i32_1 = arith.constant 0 : i32
    return %c0_i32, %c0_i32_0 : i32, i32
  }
  func.func @transform_5(%arg0: i32) -> (i32, i32) {
    %c0_i32 = arith.constant 0 : i32
    %c0_i32_0 = arith.constant 0 : i32
    %c0_i32_1 = arith.constant 0 : i32
    return %c0_i32, %c0_i32_0 : i32, i32
  }
  func.func @transform_6(%arg0: i32) -> (i32, i32, i32) {
    %c0_i32 = arith.constant 0 : i32
    %c0_i32_0 = arith.constant 0 : i32
    %c0_i32_1 = arith.constant 0 : i32
    return %arg0, %c0_i32, %c0_i32_0 : i32, i32, i32
  }
}

module attributes {stable_mosaic.version = 11 : i64} {
  func.func @_attn_proj_kernel(%arg0: i32, %arg1: memref<1x9x32xf32, #tpu.memory_space<vmem>>, %arg2: memref<1x16x32xf32, #tpu.memory_space<vmem>>, %arg3: memref<1x16x32xf32, #tpu.memory_space<vmem>>, %arg4: memref<1x4x16x8xf32, #tpu.memory_space<vmem>>, %arg5: memref<32x32xf32, #tpu.memory_space<vmem>>, %arg6: memref<1x32xf32, #tpu.memory_space<vmem>>, %arg7: memref<1x9x32xf32, #tpu.memory_space<vmem>>) attributes {dimension_semantics = [#tpu.dimension_semantics<parallel>], iteration_bounds = array<i64: 2>, scalar_prefetch = 0 : i64, scratch_operands = 0 : i64, tpu.core_type = #tpu.core_type<tc>, window_params = [{transform_indices = @transform_0, window_bounds = array<i64: 1, 9, 32>}, {transform_indices = @transform_1, window_bounds = array<i64: 1, 16, 32>}, {transform_indices = @transform_2, window_bounds = array<i64: 1, 16, 32>}, {transform_indices = @transform_3, window_bounds = array<i64: 1, 4, 16, 8>}, {pipeline_mode = #tpu.pipeline_mode<synchronous>, transform_indices = @transform_4, window_bounds = array<i64: 32, 32>}, {pipeline_mode = #tpu.pipeline_mode<synchronous>, transform_indices = @transform_5, window_bounds = array<i64: 1, 32>}, {transform_indices = @transform_6, window_bounds = array<i64: 1, 9, 32>}]} {
    %c0 = arith.constant 0 : index
    %c0_0 = arith.constant 0 : index
    %c0_1 = arith.constant 0 : index
    %0 = vector.load %arg1[%c0, %c0_0, %c0_1] : memref<1x9x32xf32, #tpu.memory_space<vmem>>, vector<1x9x32xf32>
    %1 = vector.shape_cast %0 : vector<1x9x32xf32> to vector<9x32xf32>
    %c0_2 = arith.constant 0 : index
    %c0_3 = arith.constant 0 : index
    %c0_4 = arith.constant 0 : index
    %2 = vector.load %arg2[%c0_2, %c0_3, %c0_4] : memref<1x16x32xf32, #tpu.memory_space<vmem>>, vector<1x16x32xf32>
    %3 = vector.shape_cast %2 : vector<1x16x32xf32> to vector<16x32xf32>
    %c0_5 = arith.constant 0 : index
    %c0_6 = arith.constant 0 : index
    %c0_7 = arith.constant 0 : index
    %4 = vector.load %arg3[%c0_5, %c0_6, %c0_7] : memref<1x16x32xf32, #tpu.memory_space<vmem>>, vector<1x16x32xf32>
    %5 = vector.shape_cast %4 : vector<1x16x32xf32> to vector<16x32xf32>
    %c0_8 = arith.constant 0 : index
    %c0_9 = arith.constant 0 : index
    %6 = vector.load %arg5[%c0_8, %c0_9] : memref<32x32xf32, #tpu.memory_space<vmem>>, vector<32x32xf32>
    %cst = arith.constant 0.000000e+00 : f32
    %7 = vector.broadcast %cst : f32 to vector<8x32xf32>
    %cst_10 = arith.constant 0.000000e+00 : f32
    %8 = vector.broadcast %cst_10 : f32 to vector<1x32xf32>
    %9 = vector.extract_strided_slice %1 {offsets = [0, 0], sizes = [9, 8], strides = [1, 1]} : vector<9x32xf32> to vector<9x8xf32>
    %cst_11 = arith.constant 0.353553385 : f32
    %10 = vector.broadcast %cst_11 : f32 to vector<9x8xf32>
    %11 = arith.mulf %9, %10 : vector<9x8xf32>
    %12 = vector.extract_strided_slice %3 {offsets = [0, 0], sizes = [16, 8], strides = [1, 1]} : vector<16x32xf32> to vector<16x8xf32>
    %13 = vector.extract_strided_slice %5 {offsets = [0, 0], sizes = [16, 8], strides = [1, 1]} : vector<16x32xf32> to vector<16x8xf32>
    %cst_12 = arith.constant dense<0.000000e+00> : vector<9x16xf32>
    %14 = tpu.matmul %11, %12, %cst_12 {dimension_numbers = #tpu.dot_dimension_numbers<[1], [1], [0], [0], [0, 0, 1, 0], [], []>} : vector<9x8xf32>, vector<16x8xf32>, vector<9x16xf32> -> vector<9x16xf32>
    %cst_13 = arith.constant dense<0xFF800000> : vector<9xf32>
    %15 = vector.multi_reduction <maximumf>, %14, %cst_13 [1] : vector<9x16xf32> to vector<9xf32>
    %16 = vector.shape_cast %15 : vector<9xf32> to vector<9x1xf32>
    %17 = vector.broadcast %16 : vector<9x1xf32> to vector<9x16xf32>
    %18 = arith.subf %14, %17 : vector<9x16xf32>
    %19 = math.exp %18 : vector<9x16xf32>
    %cst_14 = arith.constant dense<0.000000e+00> : vector<9xf32>
    %20 = vector.multi_reduction <add>, %19, %cst_14 [1] : vector<9x16xf32> to vector<9xf32>
    %21 = vector.shape_cast %20 : vector<9xf32> to vector<9x1xf32>
    %22 = tpu.reciprocal %21 {approx = true} : vector<9x1xf32> -> vector<9x1xf32>
    %23 = vector.broadcast %22 : vector<9x1xf32> to vector<9x16xf32>
    %24 = arith.mulf %19, %23 : vector<9x16xf32>
    %c0_15 = arith.constant 0 : index
    %c0_16 = arith.constant 0 : index
    %c0_17 = arith.constant 0 : index
    %c0_18 = arith.constant 0 : index
    %25 = vector.load %arg4[%c0_15, %c0_16, %c0_17, %c0_18] : memref<1x4x16x8xf32, #tpu.memory_space<vmem>>, vector<1x1x16x8xf32>
    %26 = vector.shape_cast %25 : vector<1x1x16x8xf32> to vector<16x8xf32>
    %27 = tpu.transpose %26, [1, 0] : vector<16x8xf32> -> vector<8x16xf32>
    %28 = vector.extract_strided_slice %24 {offsets = [0, 0], sizes = [8, 16], strides = [1, 1]} : vector<9x16xf32> to vector<8x16xf32>
    %29 = arith.mulf %28, %27 : vector<8x16xf32>
    %cst_19 = arith.constant dense<0.000000e+00> : vector<8x8xf32>
    %30 = tpu.matmul %29, %13, %cst_19 {dimension_numbers = #tpu.dot_dimension_numbers<[1], [0], [0], [1], [0, 0, 1, 1], [], []>} : vector<8x16xf32>, vector<16x8xf32>, vector<8x8xf32> -> vector<8x8xf32>
    %31 = vector.extract_strided_slice %24 {offsets = [8, 0], sizes = [1, 16], strides = [1, 1]} : vector<9x16xf32> to vector<1x16xf32>
    %cst_20 = arith.constant dense<0.000000e+00> : vector<1x8xf32>
    %32 = tpu.matmul %31, %13, %cst_20 {dimension_numbers = #tpu.dot_dimension_numbers<[1], [0], [0], [1], [0, 0, 1, 1], [], []>} : vector<1x16xf32>, vector<16x8xf32>, vector<1x8xf32> -> vector<1x8xf32>
    %33 = vector.extract_strided_slice %6 {offsets = [0, 0], sizes = [8, 32], strides = [1, 1]} : vector<32x32xf32> to vector<8x32xf32>
    %cst_21 = arith.constant dense<0.000000e+00> : vector<8x32xf32>
    %34 = tpu.matmul %30, %33, %cst_21 {dimension_numbers = #tpu.dot_dimension_numbers<[1], [0], [0], [1], [0, 0, 1, 1], [], []>} : vector<8x8xf32>, vector<8x32xf32>, vector<8x32xf32> -> vector<8x32xf32>
    %35 = arith.addf %7, %34 : vector<8x32xf32>
    %cst_22 = arith.constant dense<0.000000e+00> : vector<1x32xf32>
    %36 = tpu.matmul %32, %33, %cst_22 {dimension_numbers = #tpu.dot_dimension_numbers<[1], [0], [0], [1], [0, 0, 1, 1], [], []>} : vector<1x8xf32>, vector<8x32xf32>, vector<1x32xf32> -> vector<1x32xf32>
    %37 = arith.addf %8, %36 : vector<1x32xf32>
    %38 = vector.extract_strided_slice %1 {offsets = [0, 8], sizes = [9, 8], strides = [1, 1]} : vector<9x32xf32> to vector<9x8xf32>
    %cst_23 = arith.constant 0.353553385 : f32
    %39 = vector.broadcast %cst_23 : f32 to vector<9x8xf32>
    %40 = arith.mulf %38, %39 : vector<9x8xf32>
    %41 = vector.extract_strided_slice %3 {offsets = [0, 8], sizes = [16, 8], strides = [1, 1]} : vector<16x32xf32> to vector<16x8xf32>
    %42 = vector.extract_strided_slice %5 {offsets = [0, 8], sizes = [16, 8], strides = [1, 1]} : vector<16x32xf32> to vector<16x8xf32>
    %cst_24 = arith.constant dense<0.000000e+00> : vector<9x16xf32>
    %43 = tpu.matmul %40, %41, %cst_24 {dimension_numbers = #tpu.dot_dimension_numbers<[1], [1], [0], [0], [0, 0, 1, 0], [], []>} : vector<9x8xf32>, vector<16x8xf32>, vector<9x16xf32> -> vector<9x16xf32>
    %cst_25 = arith.constant dense<0xFF800000> : vector<9xf32>
    %44 = vector.multi_reduction <maximumf>, %43, %cst_25 [1] : vector<9x16xf32> to vector<9xf32>
    %45 = vector.shape_cast %44 : vector<9xf32> to vector<9x1xf32>
    %46 = vector.broadcast %45 : vector<9x1xf32> to vector<9x16xf32>
    %47 = arith.subf %43, %46 : vector<9x16xf32>
    %48 = math.exp %47 : vector<9x16xf32>
    %cst_26 = arith.constant dense<0.000000e+00> : vector<9xf32>
    %49 = vector.multi_reduction <add>, %48, %cst_26 [1] : vector<9x16xf32> to vector<9xf32>
    %50 = vector.shape_cast %49 : vector<9xf32> to vector<9x1xf32>
    %51 = tpu.reciprocal %50 {approx = true} : vector<9x1xf32> -> vector<9x1xf32>
    %52 = vector.broadcast %51 : vector<9x1xf32> to vector<9x16xf32>
    %53 = arith.mulf %48, %52 : vector<9x16xf32>
    %c0_27 = arith.constant 0 : index
    %c1 = arith.constant 1 : index
    %c0_28 = arith.constant 0 : index
    %c0_29 = arith.constant 0 : index
    %54 = vector.load %arg4[%c0_27, %c1, %c0_28, %c0_29] : memref<1x4x16x8xf32, #tpu.memory_space<vmem>>, vector<1x1x16x8xf32>
    %55 = vector.shape_cast %54 : vector<1x1x16x8xf32> to vector<16x8xf32>
    %56 = tpu.transpose %55, [1, 0] : vector<16x8xf32> -> vector<8x16xf32>
    %57 = vector.extract_strided_slice %53 {offsets = [0, 0], sizes = [8, 16], strides = [1, 1]} : vector<9x16xf32> to vector<8x16xf32>
    %58 = arith.mulf %57, %56 : vector<8x16xf32>
    %cst_30 = arith.constant dense<0.000000e+00> : vector<8x8xf32>
    %59 = tpu.matmul %58, %42, %cst_30 {dimension_numbers = #tpu.dot_dimension_numbers<[1], [0], [0], [1], [0, 0, 1, 1], [], []>} : vector<8x16xf32>, vector<16x8xf32>, vector<8x8xf32> -> vector<8x8xf32>
    %60 = vector.extract_strided_slice %53 {offsets = [8, 0], sizes = [1, 16], strides = [1, 1]} : vector<9x16xf32> to vector<1x16xf32>
    %cst_31 = arith.constant dense<0.000000e+00> : vector<1x8xf32>
    %61 = tpu.matmul %60, %42, %cst_31 {dimension_numbers = #tpu.dot_dimension_numbers<[1], [0], [0], [1], [0, 0, 1, 1], [], []>} : vector<1x16xf32>, vector<16x8xf32>, vector<1x8xf32> -> vector<1x8xf32>
    %62 = vector.extract_strided_slice %6 {offsets = [8, 0], sizes = [8, 32], strides = [1, 1]} : vector<32x32xf32> to vector<8x32xf32>
    %cst_32 = arith.constant dense<0.000000e+00> : vector<8x32xf32>
    %63 = tpu.matmul %59, %62, %cst_32 {dimension_numbers = #tpu.dot_dimension_numbers<[1], [0], [0], [1], [0, 0, 1, 1], [], []>} : vector<8x8xf32>, vector<8x32xf32>, vector<8x32xf32> -> vector<8x32xf32>
    %64 = arith.addf %35, %63 : vector<8x32xf32>
    %cst_33 = arith.constant dense<0.000000e+00> : vector<1x32xf32>
    %65 = tpu.matmul %61, %62, %cst_33 {dimension_numbers = #tpu.dot_dimension_numbers<[1], [0], [0], [1], [0, 0, 1, 1], [], []>} : vector<1x8xf32>, vector<8x32xf32>, vector<1x32xf32> -> vector<1x32xf32>
    %66 = arith.addf %37, %65 : vector<1x32xf32>
    %67 = vector.extract_strided_slice %1 {offsets = [0, 16], sizes = [9, 8], strides = [1, 1]} : vector<9x32xf32> to vector<9x8xf32>
    %cst_34 = arith.constant 0.353553385 : f32
    %68 = vector.broadcast %cst_34 : f32 to vector<9x8xf32>
    %69 = arith.mulf %67, %68 : vector<9x8xf32>
    %70 = vector.extract_strided_slice %3 {offsets = [0, 16], sizes = [16, 8], strides = [1, 1]} : vector<16x32xf32> to vector<16x8xf32>
    %71 = vector.extract_strided_slice %5 {offsets = [0, 16], sizes = [16, 8], strides = [1, 1]} : vector<16x32xf32> to vector<16x8xf32>
    %cst_35 = arith.constant dense<0.000000e+00> : vector<9x16xf32>
    %72 = tpu.matmul %69, %70, %cst_35 {dimension_numbers = #tpu.dot_dimension_numbers<[1], [1], [0], [0], [0, 0, 1, 0], [], []>} : vector<9x8xf32>, vector<16x8xf32>, vector<9x16xf32> -> vector<9x16xf32>
    %cst_36 = arith.constant dense<0xFF800000> : vector<9xf32>
    %73 = vector.multi_reduction <maximumf>, %72, %cst_36 [1] : vector<9x16xf32> to vector<9xf32>
    %74 = vector.shape_cast %73 : vector<9xf32> to vector<9x1xf32>
    %75 = vector.broadcast %74 : vector<9x1xf32> to vector<9x16xf32>
    %76 = arith.subf %72, %75 : vector<9x16xf32>
    %77 = math.exp %76 : vector<9x16xf32>
    %cst_37 = arith.constant dense<0.000000e+00> : vector<9xf32>
    %78 = vector.multi_reduction <add>, %77, %cst_37 [1] : vector<9x16xf32> to vector<9xf32>
    %79 = vector.shape_cast %78 : vector<9xf32> to vector<9x1xf32>
    %80 = tpu.reciprocal %79 {approx = true} : vector<9x1xf32> -> vector<9x1xf32>
    %81 = vector.broadcast %80 : vector<9x1xf32> to vector<9x16xf32>
    %82 = arith.mulf %77, %81 : vector<9x16xf32>
    %c0_38 = arith.constant 0 : index
    %c2 = arith.constant 2 : index
    %c0_39 = arith.constant 0 : index
    %c0_40 = arith.constant 0 : index
    %83 = vector.load %arg4[%c0_38, %c2, %c0_39, %c0_40] : memref<1x4x16x8xf32, #tpu.memory_space<vmem>>, vector<1x1x16x8xf32>
    %84 = vector.shape_cast %83 : vector<1x1x16x8xf32> to vector<16x8xf32>
    %85 = tpu.transpose %84, [1, 0] : vector<16x8xf32> -> vector<8x16xf32>
    %86 = vector.extract_strided_slice %82 {offsets = [0, 0], sizes = [8, 16], strides = [1, 1]} : vector<9x16xf32> to vector<8x16xf32>
    %87 = arith.mulf %86, %85 : vector<8x16xf32>
    %cst_41 = arith.constant dense<0.000000e+00> : vector<8x8xf32>
    %88 = tpu.matmul %87, %71, %cst_41 {dimension_numbers = #tpu.dot_dimension_numbers<[1], [0], [0], [1], [0, 0, 1, 1], [], []>} : vector<8x16xf32>, vector<16x8xf32>, vector<8x8xf32> -> vector<8x8xf32>
    %89 = vector.extract_strided_slice %82 {offsets = [8, 0], sizes = [1, 16], strides = [1, 1]} : vector<9x16xf32> to vector<1x16xf32>
    %cst_42 = arith.constant dense<0.000000e+00> : vector<1x8xf32>
    %90 = tpu.matmul %89, %71, %cst_42 {dimension_numbers = #tpu.dot_dimension_numbers<[1], [0], [0], [1], [0, 0, 1, 1], [], []>} : vector<1x16xf32>, vector<16x8xf32>, vector<1x8xf32> -> vector<1x8xf32>
    %91 = vector.extract_strided_slice %6 {offsets = [16, 0], sizes = [8, 32], strides = [1, 1]} : vector<32x32xf32> to vector<8x32xf32>
    %cst_43 = arith.constant dense<0.000000e+00> : vector<8x32xf32>
    %92 = tpu.matmul %88, %91, %cst_43 {dimension_numbers = #tpu.dot_dimension_numbers<[1], [0], [0], [1], [0, 0, 1, 1], [], []>} : vector<8x8xf32>, vector<8x32xf32>, vector<8x32xf32> -> vector<8x32xf32>
    %93 = arith.addf %64, %92 : vector<8x32xf32>
    %cst_44 = arith.constant dense<0.000000e+00> : vector<1x32xf32>
    %94 = tpu.matmul %90, %91, %cst_44 {dimension_numbers = #tpu.dot_dimension_numbers<[1], [0], [0], [1], [0, 0, 1, 1], [], []>} : vector<1x8xf32>, vector<8x32xf32>, vector<1x32xf32> -> vector<1x32xf32>
    %95 = arith.addf %66, %94 : vector<1x32xf32>
    %96 = vector.extract_strided_slice %1 {offsets = [0, 24], sizes = [9, 8], strides = [1, 1]} : vector<9x32xf32> to vector<9x8xf32>
    %cst_45 = arith.constant 0.353553385 : f32
    %97 = vector.broadcast %cst_45 : f32 to vector<9x8xf32>
    %98 = arith.mulf %96, %97 : vector<9x8xf32>
    %99 = vector.extract_strided_slice %3 {offsets = [0, 24], sizes = [16, 8], strides = [1, 1]} : vector<16x32xf32> to vector<16x8xf32>
    %100 = vector.extract_strided_slice %5 {offsets = [0, 24], sizes = [16, 8], strides = [1, 1]} : vector<16x32xf32> to vector<16x8xf32>
    %cst_46 = arith.constant dense<0.000000e+00> : vector<9x16xf32>
    %101 = tpu.matmul %98, %99, %cst_46 {dimension_numbers = #tpu.dot_dimension_numbers<[1], [1], [0], [0], [0, 0, 1, 0], [], []>} : vector<9x8xf32>, vector<16x8xf32>, vector<9x16xf32> -> vector<9x16xf32>
    %cst_47 = arith.constant dense<0xFF800000> : vector<9xf32>
    %102 = vector.multi_reduction <maximumf>, %101, %cst_47 [1] : vector<9x16xf32> to vector<9xf32>
    %103 = vector.shape_cast %102 : vector<9xf32> to vector<9x1xf32>
    %104 = vector.broadcast %103 : vector<9x1xf32> to vector<9x16xf32>
    %105 = arith.subf %101, %104 : vector<9x16xf32>
    %106 = math.exp %105 : vector<9x16xf32>
    %cst_48 = arith.constant dense<0.000000e+00> : vector<9xf32>
    %107 = vector.multi_reduction <add>, %106, %cst_48 [1] : vector<9x16xf32> to vector<9xf32>
    %108 = vector.shape_cast %107 : vector<9xf32> to vector<9x1xf32>
    %109 = tpu.reciprocal %108 {approx = true} : vector<9x1xf32> -> vector<9x1xf32>
    %110 = vector.broadcast %109 : vector<9x1xf32> to vector<9x16xf32>
    %111 = arith.mulf %106, %110 : vector<9x16xf32>
    %c0_49 = arith.constant 0 : index
    %c3 = arith.constant 3 : index
    %c0_50 = arith.constant 0 : index
    %c0_51 = arith.constant 0 : index
    %112 = vector.load %arg4[%c0_49, %c3, %c0_50, %c0_51] : memref<1x4x16x8xf32, #tpu.memory_space<vmem>>, vector<1x1x16x8xf32>
    %113 = vector.shape_cast %112 : vector<1x1x16x8xf32> to vector<16x8xf32>
    %114 = tpu.transpose %113, [1, 0] : vector<16x8xf32> -> vector<8x16xf32>
    %115 = vector.extract_strided_slice %111 {offsets = [0, 0], sizes = [8, 16], strides = [1, 1]} : vector<9x16xf32> to vector<8x16xf32>
    %116 = arith.mulf %115, %114 : vector<8x16xf32>
    %cst_52 = arith.constant dense<0.000000e+00> : vector<8x8xf32>
    %117 = tpu.matmul %116, %100, %cst_52 {dimension_numbers = #tpu.dot_dimension_numbers<[1], [0], [0], [1], [0, 0, 1, 1], [], []>} : vector<8x16xf32>, vector<16x8xf32>, vector<8x8xf32> -> vector<8x8xf32>
    %118 = vector.extract_strided_slice %111 {offsets = [8, 0], sizes = [1, 16], strides = [1, 1]} : vector<9x16xf32> to vector<1x16xf32>
    %cst_53 = arith.constant dense<0.000000e+00> : vector<1x8xf32>
    %119 = tpu.matmul %118, %100, %cst_53 {dimension_numbers = #tpu.dot_dimension_numbers<[1], [0], [0], [1], [0, 0, 1, 1], [], []>} : vector<1x16xf32>, vector<16x8xf32>, vector<1x8xf32> -> vector<1x8xf32>
    %120 = vector.extract_strided_slice %6 {offsets = [24, 0], sizes = [8, 32], strides = [1, 1]} : vector<32x32xf32> to vector<8x32xf32>
    %cst_54 = arith.constant dense<0.000000e+00> : vector<8x32xf32>
    %121 = tpu.matmul %117, %120, %cst_54 {dimension_numbers = #tpu.dot_dimension_numbers<[1], [0], [0], [1], [0, 0, 1, 1], [], []>} : vector<8x8xf32>, vector<8x32xf32>, vector<8x32xf32> -> vector<8x32xf32>
    %122 = arith.addf %93, %121 : vector<8x32xf32>
    %cst_55 = arith.constant dense<0.000000e+00> : vector<1x32xf32>
    %123 = tpu.matmul %119, %120, %cst_55 {dimension_numbers = #tpu.dot_dimension_numbers<[1], [0], [0], [1], [0, 0, 1, 1], [], []>} : vector<1x8xf32>, vector<8x32xf32>, vector<1x32xf32> -> vector<1x32xf32>
    %124 = arith.addf %95, %123 : vector<1x32xf32>
    %c0_56 = arith.constant 0 : index
    %c0_57 = arith.constant 0 : index
    %125 = vector.load %arg6[%c0_56, %c0_57] : memref<1x32xf32, #tpu.memory_space<vmem>>, vector<1x32xf32>
    %126 = vector.broadcast %125 : vector<1x32xf32> to vector<8x32xf32>
    %127 = arith.addf %122, %126 : vector<8x32xf32>
    %c0_58 = arith.constant 0 : index
    %c0_59 = arith.constant 0 : index
    %c0_60 = arith.constant 0 : index
    %128 = vector.load %arg7[%c0_58, %c0_59, %c0_60] : memref<1x9x32xf32, #tpu.memory_space<vmem>>, vector<1x8x32xf32>
    %129 = vector.shape_cast %128 : vector<1x8x32xf32> to vector<8x32xf32>
    %130 = vector.shape_cast %127 : vector<8x32xf32> to vector<1x8x32xf32>
    tpu.vector_store %arg7[%c0_58, %c0_59, %c0_60], %130 {strides = array<i32>} : memref<1x9x32xf32, #tpu.memory_space<vmem>>, vector<1x8x32xf32>,
    %131 = arith.addf %124, %125 : vector<1x32xf32>
    %c0_61 = arith.constant 0 : index
    %c8 = arith.constant 8 : index
    %c0_62 = arith.constant 0 : index
    %132 = vector.load %arg7[%c0_61, %c8, %c0_62] : memref<1x9x32xf32, #tpu.memory_space<vmem>>, vector<1x1x32xf32>
    %133 = vector.shape_cast %132 : vector<1x1x32xf32> to vector<1x32xf32>
    %134 = vector.shape_cast %131 : vector<1x32xf32> to vector<1x1x32xf32>
    tpu.vector_store %arg7[%c0_61, %c8, %c0_62], %134 {strides = array<i32>} : memref<1x9x32xf32, #tpu.memory_space<vmem>>, vector<1x1x32xf32>,
    return
  }
  func.func @transform_0(%arg0: i32) -> (i32, i32, i32) {
    %c0_i32 = arith.constant 0 : i32
    %c0_i32_0 = arith.constant 0 : i32
    %c0_i32_1 = arith.constant 0 : i32
    return %arg0, %c0_i32, %c0_i32_0 : i32, i32, i32
  }
  func.func @transform_1(%arg0: i32) -> (i32, i32, i32) {
    %c0_i32 = arith.constant 0 : i32
    %c0_i32_0 = arith.constant 0 : i32
    %c0_i32_1 = arith.constant 0 : i32
    return %arg0, %c0_i32, %c0_i32_0 : i32, i32, i32
  }
  func.func @transform_2(%arg0: i32) -> (i32, i32, i32) {
    %c0_i32 = arith.constant 0 : i32
    %c0_i32_0 = arith.constant 0 : i32
    %c0_i32_1 = arith.constant 0 : i32
    return %arg0, %c0_i32, %c0_i32_0 : i32, i32, i32
  }
  func.func @transform_3(%arg0: i32) -> (i32, i32, i32, i32) {
    %c0_i32 = arith.constant 0 : i32
    %c0_i32_0 = arith.constant 0 : i32
    %c0_i32_1 = arith.constant 0 : i32
    %c0_i32_2 = arith.constant 0 : i32
    return %arg0, %c0_i32, %c0_i32_0, %c0_i32_1 : i32, i32, i32, i32
  }
  func.func @transform_4(%arg0: i32) -> (i32, i32) {
    %c0_i32 = arith.constant 0 : i32
    %c0_i32_0 = arith.constant 0 : i32
    %c0_i32_1 = arith.constant 0 : i32
    return %c0_i32, %c0_i32_0 : i32, i32
  }
  func.func @transform_5(%arg0: i32) -> (i32, i32) {
    %c0_i32 = arith.constant 0 : i32
    %c0_i32_0 = arith.constant 0 : i32
    %c0_i32_1 = arith.constant 0 : i32
    return %c0_i32, %c0_i32_0 : i32, i32
  }
  func.func @transform_6(%arg0: i32) -> (i32, i32, i32) {
    %c0_i32 = arith.constant 0 : i32
    %c0_i32_0 = arith.constant 0 : i32
    %c0_i32_1 = arith.constant 0 : i32
    return %arg0, %c0_i32, %c0_i32_0 : i32, i32, i32
  }
}

</mosaic_0001>

<bundles_post_ra>
// kernel: kernel_attention.4
= control target key start
LH: loop header
LB: loop body
LE: loop exit
PB: predicated region body
PF: predicated region fallthrough
CT: control target
= control target key end

     0   :  { %v398_v0 = vmov 0.0   ;;  %vm27_vm0 = vcmask 261120   ;;  %vm399_vm1 = vmmov 0   ;;  %vm119_vm2 = vcmask 254976   ;;  %s559_s1 = inlined_call_operand.vmem [shape: f32[32,32], index: 1, kind: input, shape index: {}]   ;;  %s560_s0 = inlined_call_operand.vmem [shape: f32[18,32], index: 0, kind: input, shape index: {}]   ;;  %s561_s2 = inlined_call_operand.vmem [shape: f32[32,32], index: 2, kind: input, shape index: {}]   ;;  %s562_s3 = inlined_call_operand.vmem [shape: f32[32,32], index: 3, kind: input, shape index: {}]   ;;  %s563_s4 = inlined_call_operand.vmem [shape: f32[18,32], index: 4, kind: output, shape index: {0}]   ;;  %s564_s5 = inlined_call_operand.vmem [shape: f32[18,32], index: 5, kind: output, shape index: {1}]   ;;  %s565_s6 = inlined_call_operand.vmem [shape: f32[18,32], index: 6, kind: output, shape index: {2}]  }
   0x1   :  { %337 = vmatprep.subr.mxu0 %v398_v0  ;;  %388 = vmatprep.subr.mxu1 %v398_v0  ;;  %v26_v1 = vld [vmem:[%s559_s1 + $0x18] sm:$0xff]  ;;  %v25_v2 = vld [vmem:[%s559_s1 + $0x10] sm:$0xff]  ;;  %v24_v3 = vld [vmem:[%s559_s1 + $0x8] sm:$0xff] }
   0x2   :  { %338 = vmatpush3.msra.mxu0 %v26_v1  ;;  %392 = vmatpush3.msra.mxu1 %v26_v1  ;;  %v23_v4 = vld [vmem:[%s559_s1] sm:$0xff]  ;;  %v22_v6 = vld [vmem:[%s560_s0 + $0x10] sm:$0x3]  ;;  %v124_v7 = vld [vmem:[%s561_s2 + $0x18] sm:$0xff] }
   0x3   :  { %339 = vmatprep.subr.mxu0 %v398_v0  ;;  %389 = vmatprep.subr.mxu1 %v398_v0  ;;  %v20_v5 = vld [vmem:[%s560_s0] sm:$0xff]  ;;  %v211_v8 = vld [vmem:[%s562_s3 + $0x18] sm:$0xff]  ;;  %v123_v9 = vld [vmem:[%s561_s2 + $0x10] sm:$0xff] }
   0x4   :  { %340 = vmatpush3.msra.mxu0 %v25_v2  ;;  %393 = vmatpush3.msra.mxu1 %v25_v2  ;;  %v210_v10 = vld [vmem:[%s562_s3 + $0x10] sm:$0xff]  ;;  %v21_v11 = vld [vmem:[%s560_s0 + $0x8] sm:$0xff]  ;;  %v121_v14 = vld [vmem:[%s561_s2] sm:$0xff] }
   0x5   :  { %341 = vmatprep.subr.mxu0 %v398_v0  ;;  %390 = vmatprep.subr.mxu1 %v398_v0  ;;  %v122_v12 = vld [vmem:[%s561_s2 + $0x8] sm:$0xff]  ;;  %v208_v15 = vld [vmem:[%s562_s3] sm:$0xff] }
   0x6   :  { %342 = vmatpush3.msra.mxu0 %v24_v3  ;;  %394 = vmatpush3.msra.mxu1 %v24_v3  ;;  %v209_v13 = vld [vmem:[%s562_s3 + $0x8] sm:$0xff] }
   0x7   :  { %343 = vmatprep.subr.mxu0 %v398_v0  ;;  %391 = vmatprep.subr.mxu1 %v398_v0 }
   0x8   :  { %344 = vmatpush3.msra.mxu0 %v23_v4  ;;  %395 = vmatpush3.msra.mxu1 %v23_v4 }
   0x9   :  { %345 = vmatprep.mubr.msk.f32.mxu0 %vm399_vm1, %v398_v0  ;;  %351 = vmatprep.mubr.msk.f32.mxu1 %vm399_vm1, %v398_v0 }
   0xa   :  { %346 = vmatmul.mubr.msk.f32.vlgmr.msra.gmra.mxu0 %vm27_vm0, %v20_v5  ;;  %352 = vmatmul.mubr.msk.f32.vlgmr.msra.gmra.mxu1 %vm27_vm0, %v22_v6 }
   0xb   :  { %354 = vmatprep.subr.mxu1 %v398_v0  ;;  %371 = vmatprep.subr.mxu0 %v398_v0 }
   0xc   :  { %355 = vmatpush3.msra.mxu1 %v124_v7  ;;  %372 = vmatpush3.msra.mxu0 %v211_v8 }
   0xd   :  { %356 = vmatprep.subr.mxu1 %v398_v0  ;;  %373 = vmatprep.subr.mxu0 %v398_v0 }
   0xe   :  { %348 = vmatprep.mubr.msk.f32.mxu0 %vm399_vm1, %v398_v0  ;;  %357 = vmatpush3.msra.mxu1 %v123_v9 }
   0xf   :  { %374 = vmatpush3.msra.mxu0 %v210_v10  ;;  %358 = vmatprep.subr.mxu1 %v398_v0 }
  0x10   :  { %349 = vmatmul.mubr.msk.f32.gmra.mxu0 %vm27_vm0, %v21_v11  ;;  %375 = vmatprep.subr.mxu0 %v398_v0 }
  0x11   :  { %359 = vmatpush3.msra.mxu1 %v122_v12  ;;  %376 = vmatpush3.msra.mxu0 %v209_v13 }
  0x12   :  { %360 = vmatprep.subr.mxu1 %v398_v0  ;;  %377 = vmatprep.subr.mxu0 %v398_v0 }
  0x13   :  { %361 = vmatpush3.msra.mxu1 %v121_v14  ;;  %362 = vmatprep.mubr.msk.f32.mxu1 %vm399_vm1, %v398_v0 }
  0x14   :  { %378 = vmatpush3.msra.mxu0 %v208_v15  ;;  %379 = vmatprep.mubr.msk.f32.mxu0 %vm399_vm1, %v398_v0 }
  0x15   :  { %363 = vmatmul.mubr.msk.f32.vlgmr.msra.gmra.mxu1 %vm27_vm0, %v20_v5  ;;  %380 = vmatmul.mubr.msk.f32.vlgmr.msra.gmra.mxu0 %vm27_vm0, %v20_v5 }
  0x16   :  { %365 = vmatprep.mubr.msk.f32.mxu1 %vm399_vm1, %v398_v0  ;;  %382 = vmatprep.mubr.msk.f32.mxu0 %vm399_vm1, %v398_v0 }
  0x19   :  { %366 = vmatmul.mubr.msk.f32.gmra.mxu1 %vm27_vm0, %v21_v11  ;;  %383 = vmatmul.mubr.msk.f32.gmra.mxu0 %vm27_vm0, %v21_v11 }
  0x1a   :  { %368 = vmatprep.mubr.msk.f32.mxu1 %vm399_vm1, %v398_v0  ;;  %385 = vmatprep.mubr.msk.f32.mxu0 %vm399_vm1, %v398_v0 }
  0x1d   :  { %369 = vmatmul.mubr.msk.f32.gmra.mxu1 %vm27_vm0, %v22_v6  ;;  %386 = vmatmul.mubr.msk.f32.gmra.mxu0 %vm27_vm0, %v22_v6 }
  0xca   :  { %v103_v16 = vpop.f32.mrf.mxu0  ;;  %v113_v17 = vpop.f32.mrf.mxu1 }
  0xcb   :  { %117 = vst.msk [vmem:[%s563_s4] sm:$0xff] %vm27_vm0, %v103_v16 }
  0xcc   :  { %120 = vst.msk [vmem:[%s563_s4 + $0x10] sm:$0x3] %vm119_vm2, %v113_v17  ;;  %v347_v18 = vpop.f32.mrf.mxu0  ;;  %v353_v19 = vpop.f32.mrf.mxu1 }
  0xd0   :  { %v108_v20 = vpop.f32.mrf.mxu0 }
  0xd1   :  { %118 = vst.msk [vmem:[%s563_s4 + $0x8] sm:$0xff] %vm27_vm0, %v108_v20 }
  0xd2   :  { %v350_v21 = vpop.f32.mrf.mxu0 }
  0xd5   :  { %v191_v22 = vpop.f32.mrf.mxu1  ;;  %v278_v23 = vpop.f32.mrf.mxu0 }
  0xd6   :  { %205 = vst.msk [vmem:[%s564_s5] sm:$0xff] %vm27_vm0, %v191_v22  ;;  %292 = vst.msk [vmem:[%s565_s6] sm:$0xff] %vm27_vm0, %v278_v23 }
  0xd7   :  { %v364_v24 = vpop.f32.mrf.mxu1  ;;  %v381_v25 = vpop.f32.mrf.mxu0 }
  0xd9   :  { %v196_v26 = vpop.f32.mrf.mxu1  ;;  %v283_v27 = vpop.f32.mrf.mxu0 }
  0xda   :  { %206 = vst.msk [vmem:[%s564_s5 + $0x8] sm:$0xff] %vm27_vm0, %v196_v26  ;;  %293 = vst.msk [vmem:[%s565_s6 + $0x8] sm:$0xff] %vm27_vm0, %v283_v27 }
  0xdb   :  { %v367_v28 = vpop.f32.mrf.mxu1  ;;  %v384_v29 = vpop.f32.mrf.mxu0 }
  0xdd   :  { %v201_v30 = vpop.f32.mrf.mxu1  ;;  %v288_v31 = vpop.f32.mrf.mxu0 }
  0xde   :  { %207 = vst.msk [vmem:[%s564_s5 + $0x10] sm:$0x3] %vm119_vm2, %v201_v30  ;;  %294 = vst.msk [vmem:[%s565_s6 + $0x10] sm:$0x3] %vm119_vm2, %v288_v31 }
  0xdf   :  { %v370_v32 = vpop.f32.mrf.mxu1  ;;  %v387_v33 = vpop.f32.mrf.mxu0 }

// kernel: kernel_attention.5
= control target key start
LH: loop header
LB: loop body
LE: loop exit
PB: predicated region body
PF: predicated region fallthrough
CT: control target
= control target key end

     0   :  { %vm28_vm0 = vcmask 261120   ;;  %s557_s1 = inlined_call_operand.vmem [shape: f32[32,32], index: 1, kind: input, shape index: {}]   ;;  %s558_s2 = inlined_call_operand.vmem [shape: f32[32,32], index: 2, kind: input, shape index: {}]   ;;  %s559_s0 = inlined_call_operand.vmem [shape: f32[32,32], index: 0, kind: input, shape index: {}]   ;;  %s560_s3 = inlined_call_operand.vmem [shape: f32[32,32], index: 3, kind: input, shape index: {}]   ;;  %s561_s4 = inlined_call_operand.vmem [shape: f32[32,32], index: 4, kind: output, shape index: {0}]   ;;  %s562_s5 = inlined_call_operand.vmem [shape: f32[32,32], index: 5, kind: output, shape index: {1}]   ;;  %s563_s6 = inlined_call_operand.vmem [shape: f32[32,32], index: 6, kind: output, shape index: {2}]  }
   0x1   :  { %v27_v0 = vld [vmem:[%s557_s1 + $0x18] sm:$0xff]  ;;  %v26_v2 = vld [vmem:[%s557_s1 + $0x10] sm:$0xff]  ;;  %v25_v4 = vld [vmem:[%s557_s1 + $0x8] sm:$0xff] }
   0x2   :  { %v133_v1 = vld [vmem:[%s558_s2 + $0x18] sm:$0xff]  ;;  %364 = vmatprep.subr.mxu0 %v27_v0  ;;  %v132_v3 = vld [vmem:[%s558_s2 + $0x10] sm:$0xff]  ;;  %v131_v5 = vld [vmem:[%s558_s2 + $0x8] sm:$0xff] }
   0x3   :  { %378 = vmatprep.subr.mxu1 %v133_v1  ;;  %365 = vmatpush3.msra.mxu0 %v27_v0  ;;  %v24_v6 = vld [vmem:[%s557_s1] sm:$0xff]  ;;  %v21_v9 = vld [vmem:[%s559_s0 + $0x8] sm:$0xff]  ;;  %v226_v10 = vld [vmem:[%s560_s3 + $0x18] sm:$0xff] }
   0x4   :  { %379 = vmatpush3.msra.mxu1 %v133_v1  ;;  %366 = vmatprep.subr.mxu0 %v26_v2  ;;  %v130_v7 = vld [vmem:[%s558_s2] sm:$0xff]  ;;  %v225_v11 = vld [vmem:[%s560_s3 + $0x10] sm:$0xff]  ;;  %v23_v13 = vld [vmem:[%s559_s0 + $0x18] sm:$0xff] }
   0x5   :  { %380 = vmatprep.subr.mxu1 %v132_v3  ;;  %367 = vmatpush3.msra.mxu0 %v26_v2  ;;  %v20_v8 = vld [vmem:[%s559_s0] sm:$0xff]  ;;  %v22_v12 = vld [vmem:[%s559_s0 + $0x10] sm:$0xff]  ;;  %v224_v14 = vld [vmem:[%s560_s3 + $0x8] sm:$0xff] }
   0x6   :  { %381 = vmatpush3.msra.mxu1 %v132_v3  ;;  %368 = vmatprep.subr.mxu0 %v25_v4  ;;  %v223_v15 = vld [vmem:[%s560_s3] sm:$0xff] }
   0x7   :  { %382 = vmatprep.subr.mxu1 %v131_v5  ;;  %369 = vmatpush3.msra.mxu0 %v25_v4 }
   0x8   :  { %383 = vmatpush3.msra.mxu1 %v131_v5  ;;  %370 = vmatprep.subr.mxu0 %v24_v6 }
   0x9   :  { %384 = vmatprep.subr.mxu1 %v130_v7  ;;  %371 = vmatpush3.msra.mxu0 %v24_v6 }
   0xa   :  { %372 = vmatprep.mubr.msk.f32.mxu0 %vm28_vm0, %v20_v8  ;;  %385 = vmatpush3.msra.mxu1 %v130_v7 }
   0xb   :  { %386 = vmatprep.mubr.msk.f32.mxu1 %vm28_vm0, %v20_v8  ;;  %373 = vmatmul.mubr.msk.f32.vlgmr.msra.gmra.mxu0 %vm28_vm0, %v21_v9 }
   0xc   :  { %387 = vmatmul.mubr.msk.f32.vlgmr.msra.gmra.mxu1 %vm28_vm0, %v21_v9  ;;  %392 = vmatprep.subr.mxu0 %v226_v10 }
   0xd   :  { %406 = vmatprep.subr.mxu1 %v226_v10  ;;  %393 = vmatpush3.msra.mxu0 %v226_v10 }
   0xe   :  { %410 = vmatpush3.msra.mxu1 %v226_v10  ;;  %394 = vmatprep.subr.mxu0 %v225_v11 }
   0xf   :  { %407 = vmatprep.subr.mxu1 %v225_v11  ;;  %375 = vmatprep.mubr.msk.f32.mxu0 %vm28_vm0, %v22_v12 }
  0x10   :  { %389 = vmatprep.mubr.msk.f32.mxu1 %vm28_vm0, %v22_v12  ;;  %395 = vmatpush3.msra.mxu0 %v225_v11 }
  0x11   :  { %411 = vmatpush3.msra.mxu1 %v225_v11  ;;  %376 = vmatmul.mubr.msk.f32.gmra.mxu0 %vm28_vm0, %v23_v13 }
  0x12   :  { %390 = vmatmul.mubr.msk.f32.gmra.mxu1 %vm28_vm0, %v23_v13  ;;  %396 = vmatprep.subr.mxu0 %v224_v14 }
  0x13   :  { %408 = vmatprep.subr.mxu1 %v224_v14  ;;  %397 = vmatpush3.msra.mxu0 %v224_v14 }
  0x14   :  { %412 = vmatpush3.msra.mxu1 %v224_v14  ;;  %398 = vmatprep.subr.mxu0 %v223_v15 }
  0x15   :  { %409 = vmatprep.subr.mxu1 %v223_v15  ;;  %399 = vmatpush3.msra.mxu0 %v223_v15 }
  0x16   :  { %413 = vmatpush3.msra.mxu1 %v223_v15  ;;  %400 = vmatprep.mubr.msk.f32.mxu0 %vm28_vm0, %v20_v8 }
  0x17   :  { %403 = vmatprep.mubr.msk.f32.mxu1 %vm28_vm0, %v22_v12  ;;  %401 = vmatmul.mubr.msk.f32.vlgmr.msra.gmra.mxu0 %vm28_vm0, %v21_v9 }
  0x18   :  { %404 = vmatmul.mubr.msk.f32.vlgmr.msra.gmra.mxu1 %vm28_vm0, %v23_v13 }
  0xcb   :  { %v374_v16 = vpop.f32.mrf.mxu0 }
  0xcc   :  { %v388_v17 = vpop.f32.mrf.mxu1  ;;  %127 = vst.msk [vmem:[%s561_s4 + $0x8] sm:$0xff] %vm28_vm0, %v374_v16 }
  0xcd   :  { %220 = vst.msk [vmem:[%s562_s5 + $0x8] sm:$0xff] %vm28_vm0, %v388_v17  ;;  %v107_v18 = vpop.f32.mrf.mxu0 }
  0xce   :  { %v200_v19 = vpop.f32.mrf.mxu1  ;;  %126 = vst.msk [vmem:[%s561_s4] sm:$0xff] %vm28_vm0, %v107_v18 }
  0xcf   :  { %219 = vst.msk [vmem:[%s562_s5] sm:$0xff] %vm28_vm0, %v200_v19 }
  0xd1   :  { %v377_v20 = vpop.f32.mrf.mxu0 }
  0xd2   :  { %v391_v21 = vpop.f32.mrf.mxu1  ;;  %129 = vst.msk [vmem:[%s561_s4 + $0x18] sm:$0xff] %vm28_vm0, %v377_v20 }
  0xd3   :  { %222 = vst.msk [vmem:[%s562_s5 + $0x18] sm:$0xff] %vm28_vm0, %v391_v21  ;;  %v117_v22 = vpop.f32.mrf.mxu0 }
  0xd4   :  { %v210_v23 = vpop.f32.mrf.mxu1  ;;  %128 = vst.msk [vmem:[%s561_s4 + $0x10] sm:$0xff] %vm28_vm0, %v117_v22 }
  0xd5   :  { %221 = vst.msk [vmem:[%s562_s5 + $0x10] sm:$0xff] %vm28_vm0, %v210_v23 }
  0xd7   :  { %v402_v24 = vpop.f32.mrf.mxu0 }
  0xd8   :  { %v405_v25 = vpop.f32.mrf.mxu1  ;;  %313 = vst.msk [vmem:[%s563_s6 + $0x8] sm:$0xff] %vm28_vm0, %v402_v24 }
  0xd9   :  { %315 = vst.msk [vmem:[%s563_s6 + $0x18] sm:$0xff] %vm28_vm0, %v405_v25  ;;  %v293_v26 = vpop.f32.mrf.mxu0 }
  0xda   :  { %v303_v27 = vpop.f32.mrf.mxu1  ;;  %312 = vst.msk [vmem:[%s563_s6] sm:$0xff] %vm28_vm0, %v293_v26 }
  0xdb   :  { %314 = vst.msk [vmem:[%s563_s6 + $0x10] sm:$0xff] %vm28_vm0, %v303_v27 }

// kernel: kernel_attention.7
= control target key start
LH: loop header
LB: loop body
LE: loop exit
PB: predicated region body
PF: predicated region fallthrough
CT: control target
= control target key end

     0   :  { %11 = vsyncpa [#allocation3], 0  ;;  %s2129_s0 = inlined_call_operand.vmem [shape: f32[2,16,32], index: 0, kind: input, shape index: {}]   ;;  %s2130_s1 = inlined_call_operand.vmem [shape: f32[2,9,32], index: 1, kind: input, shape index: {}]   ;;  %s2131_s2 = inlined_call_operand.vmem [shape: f32[2,9,32], index: 2, kind: input, shape index: {}]   ;;  %s2132_s3 = inlined_call_operand.vmem [shape: f32[2,4,16,8], index: 3, kind: input, shape index: {}]   ;;  %s2133_s4 = inlined_call_operand.vmem [shape: f32[32,32], index: 4, kind: input, shape index: {}]   ;;  %s2134_s5 = inlined_call_operand.vmem [shape: f32[1,32], index: 5, kind: input, shape index: {}]   ;;  %s2135_s6 = inlined_call_operand.hbm [shape: f32[2,16,32], index: 6, kind: output, shape index: {}]  }
   0x1   :  { %13 = vsyncpa [#allocation3 + $0x1], 0  ;;  %s1892_s21 = smov 0   ;;  %s1894_s22 = smov 0  }
   0x2   :  { %s1896_s23 = smov 0   ;;  %s1898_s24 = smov 0  }
   0x3 LB: > { %s1913_s25 = sadd.s32 4294967295, %s1849_s24   ;;  %s1559_s26 = sadd.s32 4294967294, %s1849_s24   ;;  %s1849_s24 = sphi %s1898_s24, %s2141_s24   ;;  %s1845_s23 = sphi %s1896_s23, %s2140_s23   ;;  %s1841_s22 = sphi %s1894_s22, %s2139_s22   ;;  %s1837_s21 = sphi %s1892_s21, %s2138_s21  }
   0x4   : > { %s1917_s27 = sadd.s32 1, %s1849_s24   ;;  %s172_s28 = sadd.s32 1, %s1845_s23 }
   0x5   : > { %s169_s29 = ssub.s32 %s1849_s24, %s1917_s27  ;;  %p182_p0 = scmp.ne.s32.totalorder %s1845_s23, %s1841_s22 }
   0x6   : > { %p170_p1 = scmp.eq.s32.totalorder %s169_s29, 0  ;;  %p183_p2 = scmp.eq.s32.totalorder %s1913_s25, 1 }
   0x7   : > { %p188_p3 = scmp.ne.s32.totalorder %s1841_s22, %s1837_s21  ;;  %p189_p4 = scmp.eq.s32.totalorder %s1559_s26, 1 }
   0x8   : > { %s1928_s30 = scalar_select %p170_p1, %s1845_s23, %s172_s28  }
   0x9   : > { %p1930_p5 = por %p183_p2, %p182_p0  ;;  %p1934_p6 = por %p189_p4, %p188_p3 }
   0xa   : > { %p1562_p7 = scmp.ge.s32.totalorder %s1849_s24, 1  ;;  %p245_p8 = scmp.lt.s32.totalorder %s1849_s24, 3 }
   0xc   : > { %p246_p9 = pnand %p1562_p7, %p245_p8 }
   0xd   : > { %p290_p10 = scmp.lt.s32.totalorder (!%p246_p9), %s1913_s25, 1  ;;  %s1851_s17 = smov (!%p246_p9), 120  }
   0xe   : > { %249 = sbr.rel (%p246_p9) target bundleno = 2701 (0xa8d), region = 44  ;;  %s1852_s14 = smov (!%p246_p9), 112  }
   0xf   : > { %s1853_s15 = smov (!%p246_p9), 104   ;;  %s1616_s11 = sshll.u32 (!%p246_p9), %s1913_s25, 8 }
  0x13   : > { %s1942_s9 = scalar_select %p290_p10, %s1913_s25, 1  ;;  %vm320_vm0 = vcmask 64512   ;;  %v314_v50 = vld [vmem:[%s2133_s4] sm:$0xff]  ;;  %v315_v51 = vld [vmem:[%s2133_s4 + $0x8] sm:$0xff]  ;;  %vm1444_vm1 = vcmask 261120  }
  0x15   : > { %s1945_s10 = sshll.u32 %s1942_s9, 4  ;;  %s1615_s26 = sshll.u32 %s1942_s9, 6 }
  0x16   : > { %s299_s13 = scalar_lea.vmem %s2130_s1, %s1945_s10  ;;  %s294_s16 = scalar_lea.vmem %s2129_s0, %s1945_s10 }
  0x17   : > { %v1951_v0 = vld [vmem:[%s299_s13] sm:$0xff]  ;;  %v311_v2 = vld [vmem:[%s294_s16 + $0x8] sm:$0xff]  ;;  %s304_s20 = scalar_lea.vmem %s2131_s2, %s1945_s10  ;;  %s1992_s10 = scalar_lea.vmem %s2132_s3, %s1615_s26 }
  0x18   : > { %1653 = vmatprep.subr.msk.mxu0 %vm320_vm0, %v1951_v0  ;;  %v310_v1 = vld [vmem:[%s294_s16] sm:$0xff]  ;;  %v1963_v4 = vmul.f32 0.35355338, %v311_v2  ;;  %v428_v29 = vld [vmem:[%s1992_s10 + $0x8] sm:$0xff]  ;;  %v1580_v55 = vld [vmem:[%s1992_s10 + $0x10] sm:$0xff]  ;;  %s1854_s16 = smov [#allocation2]  }
  0x19   : > { %1654 = vmatpush3.xpose.msk.msra.mxu0 %vm320_vm0, %v1951_v0  ;;  %v1961_v3 = vmul.f32 0.35355338, %v310_v1  ;;  %v1981_v19 = vld [vmem:[%s304_s20] sm:$0xff]  ;;  %v1581_v59 = vld [vmem:[%s1992_s10 + $0x18] sm:$0xff]  ;;  %s287_s20 = sand.u32 1, %s1841_s22  }
  0x1a   : > { %1658 = vmatprep.subr.mxu1 %v1981_v19  ;;  %v427_v26 = vld [vmem:[%s1992_s10] sm:$0xff]  ;;  %s1563_s26 = sshll.u32 %s287_s20, 4 }
  0x1b   : > { %1655 = vmatprep.mubr.msk.f32.mxu0 %vm320_vm0, %v1961_v3  ;;  %512 = vrot.lane.b32.xlu1 %v1961_v3, %s1851_s17 }
  0x1c   : > { %1656 = vmatmul.mubr.msk.f32.vlgmr.msra.gmra.mxu0 %vm320_vm0, %v1963_v4  ;;  %1659 = vmatpush3.msra.mxu1 %v1981_v19 }
  0x8d   : > { %v513_v21 = vpop.permute.xlu1 %512 }
  0xdc   : > { %v1657_v5 = vpop.f32.mrf.mxu0 }
  0xdd   : > { %v408_v8 = vsel %vm320_vm0, %v1657_v5, -inf }
  0xde   : > { %v396_v6 = vpop.f32.mrf.mxu0 }
  0xdf   : > { %v405_v7 = vsel %vm320_vm0, %v396_v6, -inf }
  0xe0   : > { %406 = vmax.xlane.f32.xlu0 %v405_v7 }
  0xe4   : > { %409 = vmax.xlane.f32.xlu0 %v408_v8 }
  0xfa   : > { %516 = vrot.lane.b32.xlu0 %v1951_v0, %s1851_s17 }
 0x169   : > { %v407_v9 = vpop.xlane.xlu0 %406 }
 0x16a   : > { %v411_v10 = vsub.f32 %v396_v6, %v407_v9 }
 0x16c   : > { %v413_v13 = vmul.f32 1.442695, %v411_v10 }
 0x16d   : > { %v410_v11 = vpop.xlane.xlu0 %409 }
 0x16e   : > { %v412_v12 = vsub.f32 %v1657_v5, %v410_v11 }
 0x170   : > { %v415_v14 = vmul.f32 1.442695, %v412_v12 }
 0x171   : > { %v517_v20 = vpop.permute.xlu0 %516 }
 0x172   : > { %1757 = vpow2.f32 %v415_v14  ;;  %1663 = vmatprep.subr.msk.mxu1 %vm320_vm0, %v517_v20 }
 0x173   : > { %1759 = vpow2.f32 %v413_v13 }
 0x17f   : > { %v1758_v15 = vpop.eup %1757 }
 0x180   : > { %v420_v16 = vsel %vm320_vm0, %v1758_v15, 0.0  ;;  %v1760_v17 = vpop.eup %1759 }
 0x181   : > { %421 = vadd.xlane.f32.xlu1 %v420_v16  ;;  %v417_v18 = vsel %vm320_vm0, %v1760_v17, 0.0 }
 0x185   : > { %418 = vadd.xlane.f32.xlu1 %v417_v18 }
 0x196   : > { %514 = vrot.lane.b32.xlu1 %v1963_v4, %s1851_s17 }
 0x20a   : > { %v422_v22 = vpop.xlane.xlu1 %421 }
 0x20b   : > { %1761 = vrcp.f32 %v422_v22 }
 0x20e   : > { %v419_v23 = vpop.xlane.xlu1 %418 }
 0x20f   : > { %1763 = vrcp.f32 %v419_v23 }
 0x212   : > { %v515_v32 = vpop.permute.xlu1 %514 }
 0x218   : > { %v1762_v24 = vpop.eup %1761 }
 0x219   : > { %v426_v27 = vmul.f32 %v1762_v24, %v1758_v15 }
 0x21b   : > { %v430_v31 = vmul.f32 %v428_v29, %v426_v27  ;;  %v1591_v27 = vld [vmem:[%s1992_s10 + $0x20] sm:$0xff] }
 0x21c   : > { %v1764_v25 = vpop.eup %1763 }
 0x21d   : > { %v425_v28 = vmul.f32 %v1764_v25, %v1760_v17 }
 0x21f   : > { %v429_v30 = vmul.f32 %v427_v26, %v425_v28 }
 0x221   : > { %1660 = vmatprep.mubr.msk.f32.mxu1 %vm320_vm0, %v429_v30 }
 0x222   : > { %1661 = vmatmul.mubr.msk.f32.vlgmr.msra.gmra.mxu1 %vm320_vm0, %v430_v31  ;;  %v1592_v31 = vld [vmem:[%s1992_s10 + $0x28] sm:$0xff] }
 0x223   : > { %1664 = vmatpush3.xpose.msk.msra.mxu1 %vm320_vm0, %v517_v20  ;;  %1665 = vmatprep.mubr.msk.f32.mxu1 %vm320_vm0, %v513_v21 }
 0x224   : > { %1673 = vmatprep.subr.mxu1 %v315_v51 }
 0x226   : > { %1666 = vmatmul.mubr.msk.f32.vlgmr.msra.gmra.mxu1 %vm320_vm0, %v515_v32 }
 0x227   : > { %1674 = vmatpush3.msra.mxu1 %v315_v51 }
 0x2e2   : > { %v1662_v33 = vpop.f32.mrf.mxu1 }
 0x2e4   : > { %v503_v34 = vpop.f32.mrf.mxu1 }
 0x2e6   : > { %v1667_v35 = vpop.f32.mrf.mxu1 }
 0x2e7   : > { %v602_v36 = vsel %vm320_vm0, %v1667_v35, -inf }
 0x2e8   : > { %603 = vmax.xlane.f32.xlu0 %v602_v36  ;;  %v590_v37 = vpop.f32.mrf.mxu1 }
 0x2e9   : > { %v599_v38 = vsel %vm320_vm0, %v590_v37, -inf }
 0x2ea   : > { %600 = vmax.xlane.f32.xlu1 %v599_v38 }
 0x2fb   : > { %627 = vrot.lane.b32.xlu1 %v1981_v19, %s1851_s17  ;;  %s1793_s17 = sshll.u32 %s1854_s16, 4  ;;  %s1794_s17 = int_to_ptr.vmem [resolvable:$false] %s1793_s17 }
 0x2fc   : > { %s1795_s18 = scalar_lea.vmem %s1794_s17, 512 }
 0x2ff   : > { %873 = vrot.lane.b32.xlu1 %v1961_v3, %s1852_s14 }
 0x303   : > { %875 = vrot.lane.b32.xlu1 %v1963_v4, %s1852_s14 }
 0x371   : > { %v604_v39 = vpop.xlane.xlu0 %603 }
 0x372   : > { %v606_v40 = vsub.f32 %v1667_v35, %v604_v39 }
 0x373   : > { %v601_v41 = vpop.xlane.xlu1 %600 }
 0x374   : > { %v605_v42 = vsub.f32 %v590_v37, %v601_v41  ;;  %v609_v43 = vmul.f32 1.442695, %v606_v40 }
 0x376   : > { %v607_v44 = vmul.f32 1.442695, %v605_v42 }
 0x377   : > { %v628_v49 = vpop.permute.xlu1 %627 }
 0x378   : > { %1765 = vpow2.f32 %v607_v44  ;;  %1668 = vmatprep.subr.mxu0 %v628_v49 }
 0x379   : > { %1767 = vpow2.f32 %v609_v43  ;;  %1669 = vmatpush3.msra.mxu0 %v628_v49 }
 0x37a   : > { %1678 = vmatprep.subr.mxu0 %v314_v50 }
 0x37b   : > { %v874_v63 = vpop.permute.xlu1 %873 }
 0x37f   : > { %v876_v5 = vpop.permute.xlu1 %875 }
 0x385   : > { %v1766_v45 = vpop.eup %1765 }
 0x386   : > { %v611_v46 = vsel %vm320_vm0, %v1766_v45, 0.0  ;;  %v1768_v47 = vpop.eup %1767 }
 0x387   : > { %612 = vadd.xlane.f32.xlu0 %v611_v46  ;;  %v614_v48 = vsel %vm320_vm0, %v1768_v47, 0.0 }
 0x38b   : > { %615 = vadd.xlane.f32.xlu0 %v614_v48 }
 0x3a1   : > { %877 = vrot.lane.b32.xlu0 %v1951_v0, %s1852_s14 }
 0x410   : > { %v613_v52 = vpop.xlane.xlu0 %612 }
 0x411   : > { %1769 = vrcp.f32 %v613_v52 }
 0x414   : > { %v616_v53 = vpop.xlane.xlu0 %615 }
 0x415   : > { %1771 = vrcp.f32 %v616_v53 }
 0x418   : > { %v878_v62 = vpop.permute.xlu0 %877 }
 0x419   : > { %1683 = vmatprep.subr.msk.mxu1 %vm320_vm0, %v878_v62 }
 0x41e   : > { %v1770_v54 = vpop.eup %1769 }
 0x41f   : > { %v619_v56 = vmul.f32 %v1770_v54, %v1766_v45 }
 0x421   : > { %v624_v57 = vmul.f32 %v1580_v55, %v619_v56  ;;  %v317_v56 = vld [vmem:[%s2133_s4 + $0x18] sm:$0xff] }
 0x422   : > { %v1772_v58 = vpop.eup %1771 }
 0x423   : > { %1670 = vmatprep.mubr.msk.f32.mxu0 %vm320_vm0, %v624_v57  ;;  %v620_v60 = vmul.f32 %v1772_v58, %v1768_v47 }
 0x425   : > { %v625_v61 = vmul.f32 %v1581_v59, %v620_v60  ;;  %v1600_v60 = vld [vmem:[%s1992_s10 + $0x30] sm:$0xff] }
 0x427   : > { %1671 = vmatmul.mubr.msk.f32.vlgmr.msra.gmra.mxu0 %vm320_vm0, %v625_v61 }
 0x428   : > { %1680 = vmatprep.mubr.msk.f32.mxu0 %vm320_vm0, %v503_v34  ;;  %1679 = vmatpush3.msra.mxu0 %v314_v50  ;;  %v316_v34 = vld [vmem:[%s2133_s4 + $0x10] sm:$0xff] }
 0x42b   : > { %1681 = vmatmul.mubr.msk.f32.vlgmr.msra.gmra.mxu0 %vm320_vm0, %v1662_v33 }
 0x4e7   : > { %v1672_v1 = vpop.f32.mrf.mxu0 }
 0x4e9   : > { %v702_v2 = vpop.f32.mrf.mxu0 }
 0x4ea   : > { %1675 = vmatprep.mubr.msk.f32.mxu1 %vm320_vm0, %v702_v2 }
 0x4eb   : > { %1676 = vmatmul.mubr.msk.f32.vlgmr.msra.gmra.mxu1 %vm320_vm0, %v1672_v1  ;;  %v1682_v35 = vpop.f32.mrf.mxu0  ;;  %v1601_v1 = vld [vmem:[%s1992_s10 + $0x38] sm:$0xff]  ;;  %s289_s10 = scalar_lea.vmem [#allocation2], %s1563_s26 }
 0x4ec   : > { %1684 = vmatpush3.xpose.msk.msra.mxu1 %vm320_vm0, %v878_v62  ;;  %1685 = vmatprep.mubr.msk.f32.mxu1 %vm320_vm0, %v874_v63  ;;  %s1461_s9 = sshll.u32 %s289_s10, 4  ;;  %s2087_s9 = int_to_ptr.vmem [resolvable:$true] %s1461_s9 }
 0x4ed   : > { %1693 = vmatprep.subr.mxu1 %v316_v34  ;;  %v864_v36 = vpop.f32.mrf.mxu0  ;;  %s1789_s25 = scalar_lea.vmem %s2087_s9, 256  ;;  %p1796_p0 = scmp.lt.s32.totalorder %s2087_s9, %s1794_s17 }
 0x4ee   : > { %p1790_p11 = scmp.ne.s32.totalorder %s2087_s9, %s1789_s25  ;;  %p1797_p1 = scmp.lt.s32.totalorder %s1795_s18, %s1789_s25 }
 0x4ef   : > { %1686 = vmatmul.mubr.msk.f32.vlgmr.msra.gmra.mxu1 %vm320_vm0, %v876_v5 }
 0x4f0   : > { %1694 = vmatpush3.msra.mxu1 %v316_v34  ;;  %p1791_p12 = pnand %p1790_p11, %p1930_p5  ;;  %p1798_p2 = por %p1797_p1, %p1796_p0 }
 0x4f2   : > { %p1792_p13 = pneg %p1791_p12 }
 0x4f4   : > { %p1799_p3 = pnand %p1798_p2, %p1792_p13 }
 0x5ab   : > { %v2031_v6 = vpop.f32.mrf.mxu1 }
 0x5ad   : > { %v2033_v7 = vpop.f32.mrf.mxu1 }
 0x5af   : > { %v1687_v8 = vpop.f32.mrf.mxu1 }
 0x5b0   : > { %v963_v9 = vsel %vm320_vm0, %v1687_v8, -inf }
 0x5b1   : > { %964 = vmax.xlane.f32.xlu0 %v963_v9  ;;  %v951_v10 = vpop.f32.mrf.mxu1 }
 0x5b2   : > { %v960_v11 = vsel %vm320_vm0, %v951_v10, -inf }
 0x5b3   : > { %961 = vmax.xlane.f32.xlu1 %v960_v11 }
 0x5c4   : > { %987 = vrot.lane.b32.xlu1 %v1981_v19, %s1852_s14  ;;  %s2085_s14 = scalar_lea.hbm %s2135_s6, %s1616_s11 }
 0x5c8   : > { %1154 = vrot.lane.b32.xlu1 %v1961_v3, %s1853_s15 }
 0x5cc   : > { %1156 = vrot.lane.b32.xlu1 %v1963_v4, %s1853_s15 }
 0x63a   : > { %v965_v12 = vpop.xlane.xlu0 %964 }
 0x63b   : > { %v967_v13 = vsub.f32 %v1687_v8, %v965_v12  ;;  %v1606_v12 = vld [vmem:[%s2134_s5] ss:$0 sm:$0xff] }
 0x63c   : > { %v962_v14 = vpop.xlane.xlu1 %961 }
 0x63d   : > { %v970_v15 = vmul.f32 1.442695, %v967_v13  ;;  %v966_v16 = vsub.f32 %v951_v10, %v962_v14  ;;  %v865_v10 = vadd.f32 %v864_v36, %v2033_v7 }
 0x63f   : > { %1773 = vpow2.f32 %v970_v15  ;;  %v968_v17 = vmul.f32 1.442695, %v966_v16 }
 0x640   : > { %v988_v3 = vpop.permute.xlu1 %987 }
 0x641   : > { %1775 = vpow2.f32 %v968_v17  ;;  %1688 = vmatprep.subr.mxu0 %v988_v3 }
 0x642   : > { %1689 = vmatpush3.msra.mxu0 %v988_v3 }
 0x644   : > { %v1155_v30 = vpop.permute.xlu1 %1154 }
 0x64c   : > { %v1774_v18 = vpop.eup %1773 }
 0x64d   : > { %v975_v20 = vsel %vm320_vm0, %v1774_v18, 0.0 }
 0x64e   : > { %v1776_v21 = vpop.eup %1775  ;;  %976 = vadd.xlane.f32.xlu0 %v975_v20 }
 0x64f   : > { %v972_v22 = vsel %vm320_vm0, %v1776_v21, 0.0 }
 0x652   : > { %973 = vadd.xlane.f32.xlu0 %v972_v22 }
 0x668   : > { %1158 = vrot.lane.b32.xlu0 %v1951_v0, %s1853_s15  ;;  %v1157_v0 = vpop.permute.xlu1 %1156 }
 0x6d7   : > { %v977_v4 = vpop.xlane.xlu0 %976 }
 0x6d8   : > { %1777 = vrcp.f32 %v977_v4 }
 0x6db   : > { %v974_v23 = vpop.xlane.xlu0 %973 }
 0x6dc   : > { %1779 = vrcp.f32 %v974_v23 }
 0x6df   : > { %v1159_v24 = vpop.permute.xlu0 %1158 }
 0x6e0   : > { %1698 = vmatprep.subr.msk.mxu0 %vm320_vm0, %v1159_v24 }
 0x6e5   : > { %v1778_v25 = vpop.eup %1777 }
 0x6e6   : > { %v981_v28 = vmul.f32 %v1778_v25, %v1774_v18 }
 0x6e8   : > { %v986_v33 = vmul.f32 %v1592_v31, %v981_v28 }
 0x6e9   : > { %v1780_v26 = vpop.eup %1779 }
 0x6ea   : > { %v980_v29 = vmul.f32 %v1780_v26, %v1776_v21 }
 0x6ec   : > { %v985_v32 = vmul.f32 %v1591_v27, %v980_v29 }
 0x6ee   : > { %1690 = vmatprep.mubr.msk.f32.mxu0 %vm320_vm0, %v985_v32 }
 0x6ef   : > { %1691 = vmatmul.mubr.msk.f32.vlgmr.msra.gmra.mxu0 %vm320_vm0, %v986_v33 }
 0x6f0   : > { %1699 = vmatpush3.xpose.msk.msra.mxu0 %vm320_vm0, %v1159_v24  ;;  %1700 = vmatprep.mubr.msk.f32.mxu0 %vm320_vm0, %v1155_v30 }
 0x6f1   : > { %1708 = vmatprep.subr.mxu0 %v317_v56 }
 0x6f3   : > { %1701 = vmatmul.mubr.msk.f32.vlgmr.msra.gmra.mxu0 %vm320_vm0, %v1157_v0 }
 0x6f4   : > { %1709 = vmatpush3.msra.mxu0 %v317_v56 }
 0x7af   : > { %v1692_v37 = vpop.f32.mrf.mxu0 }
 0x7b1   : > { %v1062_v38 = vpop.f32.mrf.mxu0 }
 0x7b2   : > { %1695 = vmatprep.mubr.msk.f32.mxu1 %vm320_vm0, %v1062_v38 }
 0x7b3   : > { %1696 = vmatmul.mubr.msk.f32.vlgmr.msra.gmra.mxu1 %vm320_vm0, %v1692_v37  ;;  %v1702_v39 = vpop.f32.mrf.mxu0 }
 0x7b4   : > { %v1244_v40 = vsel %vm320_vm0, %v1702_v39, -inf }
 0x7b5   : > { %1245 = vmax.xlane.f32.xlu0 %v1244_v40  ;;  %v1232_v41 = vpop.f32.mrf.mxu0 }
 0x7b6   : > { %v1241_v42 = vsel %vm320_vm0, %v1232_v41, -inf }
 0x7b7   : > { %1242 = vmax.xlane.f32.xlu1 %v1241_v42 }
 0x7c8   : > { %1268 = vrot.lane.b32.xlu1 %v1981_v19, %s1853_s15  ;;  %v870_v19 = vadd.f32 %v1682_v35, %v2031_v6  ;;  %s2089_s15 = scalar_lea.sflag [#allocation3], %s287_s20 }
 0x83e   : > { %v1246_v43 = vpop.xlane.xlu0 %1245 }
 0x83f   : > { %v1248_v44 = vsub.f32 %v1702_v39, %v1246_v43 }
 0x840   : > { %v1243_v45 = vpop.xlane.xlu1 %1242 }
 0x841   : > { %v1247_v46 = vsub.f32 %v1232_v41, %v1243_v45  ;;  %v1251_v47 = vmul.f32 1.442695, %v1248_v44 }
 0x843   : > { %v1249_v48 = vmul.f32 1.442695, %v1247_v46 }
 0x844   : > { %v1269_v53 = vpop.permute.xlu1 %1268 }
 0x845   : > { %1781 = vpow2.f32 %v1249_v48  ;;  %1703 = vmatprep.subr.mxu1 %v1269_v53 }
 0x846   : > { %1783 = vpow2.f32 %v1251_v47  ;;  %1704 = vmatpush3.msra.mxu1 %v1269_v53 }
 0x852   : > { %v1782_v49 = vpop.eup %1781 }
 0x853   : > { %v1253_v50 = vsel %vm320_vm0, %v1782_v49, 0.0  ;;  %v1784_v51 = vpop.eup %1783 }
 0x854   : > { %1254 = vadd.xlane.f32.xlu0 %v1253_v50  ;;  %v1256_v52 = vsel %vm320_vm0, %v1784_v51, 0.0 }
 0x858   : > { %1257 = vadd.xlane.f32.xlu0 %v1256_v52 }
 0x873   : > { %v1697_v54 = vpop.f32.mrf.mxu1 }
 0x874   : > { %v1153_v55 = vadd.f32 %v1697_v54, %v870_v19 }
 0x875   : > { %v1143_v6 = vpop.f32.mrf.mxu1 }
 0x876   : > { %v1152_v13 = vadd.f32 %v1143_v6, %v865_v10 }
 0x8dd   : > { %v1255_v57 = vpop.xlane.xlu0 %1254 }
 0x8de   : > { %1785 = vrcp.f32 %v1255_v57 }
 0x8e1   : > { %v1258_v58 = vpop.xlane.xlu0 %1257 }
 0x8e2   : > { %1787 = vrcp.f32 %v1258_v58 }
 0x8eb   : > { %v1786_v59 = vpop.eup %1785 }
 0x8ec   : > { %v1261_v61 = vmul.f32 %v1786_v59, %v1782_v49 }
 0x8ee   : > { %v1266_v62 = vmul.f32 %v1600_v60, %v1261_v61 }
 0x8ef   : > { %v1788_v63 = vpop.eup %1787 }
 0x8f0   : > { %v1262_v2 = vmul.f32 %v1788_v63, %v1784_v51  ;;  %1705 = vmatprep.mubr.msk.f32.mxu1 %vm320_vm0, %v1266_v62 }
 0x8f2   : > { %v1267_v5 = vmul.f32 %v1601_v1, %v1262_v2 }
 0x8f4   : > { %1706 = vmatmul.mubr.msk.f32.vlgmr.msra.gmra.mxu1 %vm320_vm0, %v1267_v5 }
 0x9b4   : > { %v1707_v8 = vpop.f32.mrf.mxu1 }
 0x9b6   : > { %v1343_v9 = vpop.f32.mrf.mxu1 }
 0x9b7   : > { %1710 = vmatprep.mubr.msk.f32.mxu0 %vm320_vm0, %v1343_v9 }
 0x9b8   : > { %1711 = vmatmul.mubr.msk.f32.vlgmr.msra.gmra.mxu0 %vm320_vm0, %v1707_v8 }
 0xa78   : > { %v1712_v11 = vpop.f32.mrf.mxu0 }
 0xa79   : > { %v1434_v14 = vadd.f32 %v1712_v11, %v1153_v55 }
 0xa7a   : > { %v1424_v15 = vpop.f32.mrf.mxu0 }
 0xa7b   : > { %v1443_v16 = vadd.f32 %v1606_v12, %v1434_v14  ;;  %v1433_v17 = vadd.f32 %v1424_v15, %v1152_v13 }
 0xa7d   : > { %1446 = vst.msk [vmem:[%s289_s10 + $0x8] sm:$0xff] %vm1444_vm1, %v1443_v16  ;;  %v1442_v7 = vadd.f32 %v1606_v12, %v1433_v17 }
 0xa7f   : > { %1445 = vst.msk [vmem:[%s289_s10] sm:$0xff] %vm1444_vm1, %v1442_v7 }
 0xa80   : > { %1802 = shalt.err (!%p1799_p3)
}
 0xa81   : > { %s1803_s19 = scalar_lea.hbm %s2085_s14, 256  ;;  %s1807_s28 = scalar_lea.hbm %s2135_s6, 512 }
 0xa82   : > { %p1804_p4 = scmp.ne.s32.totalorder %s2085_s14, %s1803_s19  ;;  %p1808_p9 = scmp.lt.s32.totalorder %s2085_s14, %s2135_s6 }
 0xa83   : > { %p1809_p10 = scmp.lt.s32.totalorder %s1807_s28, %s1803_s19 }
 0xa84   : > { %p1805_p7 = pnand %p1804_p4, %p1930_p5 }
 0xa85   : > { %p1810_p11 = por %p1809_p10, %p1808_p9 }
 0xa86   : > { %p1806_p8 = pneg %p1805_p7 }
 0xa88   : > { %p1811_p12 = pnand %p1810_p11, %p1806_p8 }
 0xa8a   : > { %1814 = shalt.err (!%p1811_p12)
}
 0xa8b   : > { %s1855_s11 = smov 128   ;;  %s1856_s12 = smov 8  }
 0xa8c   : > { %1713 = dma.vmem_to_hbm [thread:$0]  (%p1930_p5), %s2087_s9, 256, %s2085_s14, %s2089_s15, %s1855_s11, %s1855_s11, %s1856_s12  }
 0xa8d PF: > { %p1719_p13 = scmp.ge.s32.totalorder %s1849_s24, 2  ;;  %s1476_s13 = sand.u32 1, %s1837_s21  }
 0xa8e   : > { %s1477_s25 = scalar_lea.sflag [#allocation3], %s1476_s13 }
 0xa8f   : > { %p1716_p0 = pnand %p1719_p13, %p1934_p6 }
 0xa91   : > { %p1717_p1 = pneg %p1716_p0 }
 0xa93   : > { %1832 = dma.done.wait (%p1717_p1), %s1477_s25, 256  }
 0xa94   : > { %1834 = vsyncadd (%p1717_p1), %s1477_s25, 4294967040  ;;  %p16_p2 = scmp.ge.s32.totalorder %s1917_s27, 4   ;;  %s2138_s21 = smov %s1841_s22 }
 0xa95   : > { %s2139_s22 = smov %s1845_s23  ;;  %s2140_s23 = smov %s1928_s30 }
 0xa96   : > { %s2141_s24 = smov %s1917_s27  ;;  %18 = sbr.rel (!%p16_p2) target bundleno = 3 (0x3), region = 91 }
 0xa9b   :  { %1482 = vsyncpa [#allocation3], 1 }
 0xa9c   :  { %1484 = vsyncpa [#allocation3 + $0x1], 1 }

// kernel: kernel_attention.6
= control target key start
LH: loop header
LB: loop body
LE: loop exit
PB: predicated region body
PF: predicated region fallthrough
CT: control target
= control target key end

     0   :  { %s2547_s21 = smov 0   ;;  %s2795_s0 = inlined_call_operand.vmem [shape: f32[2,9,32], index: 0, kind: input, shape index: {}]   ;;  %s2796_s1 = inlined_call_operand.vmem [shape: f32[2,16,32], index: 1, kind: input, shape index: {}]   ;;  %s2797_s2 = inlined_call_operand.vmem [shape: f32[2,16,32], index: 2, kind: input, shape index: {}]   ;;  %s2798_s3 = inlined_call_operand.vmem [shape: f32[2,4,16,8], index: 3, kind: input, shape index: {}]   ;;  %s2799_s4 = inlined_call_operand.vmem [shape: f32[32,32], index: 4, kind: input, shape index: {}]   ;;  %s2800_s5 = inlined_call_operand.vmem [shape: f32[1,32], index: 5, kind: input, shape index: {}]   ;;  %s2801_s6 = inlined_call_operand.vmem [shape: f32[2,9,32], index: 6, kind: output, shape index: {}]  }
   0x1 LB: > { %s2214_s22 = sadd.s32 4294967295, %s2505_s21   ;;  %p2218_p0 = scmp.ge.s32.totalorder %s2505_s21, 1  ;;  %s2505_s21 = sphi %s2547_s21, %s16_s21  }
   0x2   : > { %p242_p1 = scmp.lt.s32.totalorder %s2505_s21, 3 }
   0x4   : > { %p243_p2 = pnand %p2218_p0, %p242_p1 }
   0x5   : > { %p287_p3 = scmp.lt.s32.totalorder (!%p243_p2), %s2214_s22, 1  ;;  %s2507_s30 = smov (!%p243_p2), 120  }
   0x6   : > { %246 = sbr.rel (%p243_p2) target bundleno = 2526 (0x9de), region = 44  ;;  %s2510_s14 = smov (!%p243_p2), 112  }
   0x7   : > { %s2511_s19 = smov (!%p243_p2), 104  }
   0xb   : > { %s2803_s22 = smov (!%p287_p3, %s2214_s22), 1  ;;  %vm324_vm0 = vcmask 64512   ;;  %vm416_vm1 = vcmask 122880   ;;  %vm412_vm2 = vcmask 130048   ;;  %v2508_v40 = vmov 0.0   ;;  %v318_v63 = vld [vmem:[%s2799_s4] sm:$0xff] }
   0xc   : > { %s2558_s23 = sshll.u32 %s2803_s22, 4  ;;  %2337 = vmatprep.subr.mxu1 %v2508_v40  ;;  %s2272_s10 = sshll.u32 %s2803_s22, 6  ;;  %vm2509_vm3 = vmmov 0   ;;  %vm2118_vm4 = vcmask 261120   ;;  %vm2121_vm5 = vcmask 253952  }
   0xd   : > { %s296_s26 = scalar_lea.vmem %s2796_s1, %s2558_s23  ;;  %s291_s29 = scalar_lea.vmem %s2795_s0, %s2558_s23  ;;  %2341 = vmatprep.mubr.msk.f32.mxu1 %vm2509_vm3, %v2508_v40 }
   0xe   : > { %v2564_v0 = vld [vmem:[%s296_s26 + $0x8] sm:$0xff]  ;;  %v2566_v1 = vld [vmem:[%s296_s26] sm:$0xff]  ;;  %s301_s9 = scalar_lea.vmem %s2797_s2, %s2558_s23  ;;  %s2638_s13 = scalar_lea.vmem %s2798_s3, %s2272_s10 }
   0xf   : > { %623 = vrot.lane.b32.xlu0 %v2564_v0, %s2507_s30  ;;  %2330 = vmatprep.subr.msk.mxu0 %vm324_vm0, %v2564_v0  ;;  %v312_v2 = vld [vmem:[%s291_s29] sm:$0xff]  ;;  %v313_v3 = vld [vmem:[%s291_s29 + $0x8] sm:$0x1]  ;;  %v2239_v41 = vld [vmem:[%s2638_s13 + $0x10] sm:$0xff] }
  0x10   : > { %2331 = vmatpush3.xpose.msk.msra.mxu0 %vm324_vm0, %v2564_v0  ;;  %v2578_v4 = vmul.f32 0.35355338, %v312_v2  ;;  %v2586_v5 = vmul.f32 0.35355338, %v313_v3  ;;  %v2608_v14 = vld [vmem:[%s301_s9 + $0x8] sm:$0xff]  ;;  %v2619_v29 = vld [vmem:[%s301_s9] sm:$0xff] }
  0x11   : > { %2332 = vmatprep.subr.msk.mxu0 %vm324_vm0, %v2566_v1  ;;  %2338 = vmatpush3.msra.mxu1 %v2608_v14  ;;  %v436_v42 = vld [vmem:[%s2638_s13] sm:$0xff]  ;;  %v2240_v43 = vld [vmem:[%s2638_s13 + $0x18] sm:$0xff]  ;;  %v437_v44 = vld [vmem:[%s2638_s13 + $0x8] sm:$0xff] }
  0x12   : > { %617 = vrot.lane.b32.xlu1 %v2578_v4, %s2507_s30  ;;  %2334 = vmatprep.mubr.msk.f32.mxu0 %vm324_vm0, %v2578_v4  ;;  %v319_v2 = vld [vmem:[%s2799_s4 + $0x8] sm:$0xff] }
  0x13   : > { %621 = vrot.lane.b32.xlu0 %v2566_v1, %s2507_s30  ;;  %2339 = vmatprep.subr.mxu1 %v2508_v40 }
  0x14   : > { %2333 = vmatpush3.xpose.msk.msra.mxu0 %vm324_vm0, %v2566_v1  ;;  %2340 = vmatpush3.msra.mxu1 %v2619_v29 }
  0x15   : > { %2344 = vmatprep.subr.mxu1 %v2508_v40 }
  0x16   : > { %619 = vrot.lane.b32.xlu1 %v2586_v5, %s2507_s30 }
  0x17   : > { %2335 = vmatmul.mubr.msk.f32.vlgmr.msra.gmra.mxu0 %vm324_vm0, %v2586_v5 }
  0x81   : > { %v624_v6 = vpop.permute.xlu0 %623 }
  0x82   : > { %2351 = vmatprep.subr.msk.mxu0 %vm324_vm0, %v624_v6 }
  0x83   : > { %2352 = vmatpush3.xpose.msk.msra.mxu0 %vm324_vm0, %v624_v6 }
  0x84   : > { %v618_v7 = vpop.permute.xlu1 %617 }
  0x85   : > { %v622_v8 = vpop.permute.xlu0 %621  ;;  %2355 = vmatprep.mubr.msk.f32.mxu0 %vm324_vm0, %v618_v7 }
  0x86   : > { %2353 = vmatprep.subr.msk.mxu0 %vm324_vm0, %v622_v8 }
  0x87   : > { %2354 = vmatpush3.xpose.msk.msra.mxu0 %vm324_vm0, %v622_v8 }
  0x88   : > { %v620_v9 = vpop.permute.xlu1 %619  ;;  %2372 = vmatprep.subr.mxu0 %v2508_v40 }
  0x8a   : > { %2356 = vmatmul.mubr.msk.f32.vlgmr.msra.gmra.mxu0 %vm324_vm0, %v620_v9 }
  0x8b   : > { %2374 = vmatprep.mubr.msk.f32.mxu0 %vm2509_vm3, %v2508_v40  ;;  %2373 = vmatpush3.msra.mxu0 %v319_v2 }
  0x8c   : > { %2382 = vmatprep.subr.mxu0 %v2508_v40 }
  0xd7   : > { %v2336_v10 = vpop.f32.mrf.mxu0 }
  0xd8   : > { %v417_v11 = vsel %vm416_vm1, %v2336_v10, -inf }
  0xd9   : > { %418 = vmax.xlane.f32.xlu1 %v417_v11  ;;  %v403_v12 = vpop.f32.mrf.mxu0 }
  0xda   : > { %v413_v13 = vsel %vm412_vm2, %v403_v12, -inf }
  0xdb   : > { %414 = vmax.xlane.f32.xlu0 %v413_v13 }
  0xea   : > { %770 = vrot.lane.b32.xlu1 %v2608_v14, %s2507_s30 }
 0x14a   : > { %v2357_v15 = vpop.f32.mrf.mxu0 }
 0x14b   : > { %v711_v18 = vsel %vm416_vm1, %v2357_v15, -inf }
 0x14c   : > { %v699_v16 = vpop.f32.mrf.mxu0 }
 0x14d   : > { %v708_v17 = vsel %vm412_vm2, %v699_v16, -inf }
 0x14e   : > { %709 = vmax.xlane.f32.xlu0 %v708_v17 }
 0x152   : > { %712 = vmax.xlane.f32.xlu0 %v711_v18 }
 0x162   : > { %v419_v19 = vpop.xlane.xlu1 %418 }
 0x163   : > { %v421_v20 = vsub.f32 %v2336_v10, %v419_v19 }
 0x164   : > { %v415_v21 = vpop.xlane.xlu0 %414 }
 0x165   : > { %v424_v22 = vmul.f32 1.442695, %v421_v20  ;;  %v420_v23 = vsub.f32 %v403_v12, %v415_v21 }
 0x166   : > { %v771_v45 = vpop.permute.xlu1 %770 }
 0x167   : > { %2467 = vpow2.f32 %v424_v22  ;;  %v422_v24 = vmul.f32 1.442695, %v420_v23 }
 0x169   : > { %2469 = vpow2.f32 %v422_v24 }
 0x174   : > { %v2614_v25 = vpop.eup %2467 }
 0x175   : > { %v429_v26 = vsel %vm416_vm1, %v2614_v25, 0.0 }
 0x176   : > { %v2470_v27 = vpop.eup %2469  ;;  %430 = vadd.xlane.f32.xlu0 %v429_v26 }
 0x177   : > { %v426_v28 = vsel %vm412_vm2, %v2470_v27, 0.0 }
 0x178   : > { %427 = vadd.xlane.f32.xlu1 %v426_v28 }
 0x18c   : > { %768 = vrot.lane.b32.xlu0 %v2619_v29, %s2507_s30  ;;  %s311_s30 = scalar_lea.vmem %s2801_s6, %s2558_s23 }
 0x1d7   : > { %v710_v30 = vpop.xlane.xlu0 %709 }
 0x1d8   : > { %v714_v31 = vsub.f32 %v699_v16, %v710_v30 }
 0x1da   : > { %v716_v32 = vmul.f32 1.442695, %v714_v31 }
 0x1db   : > { %v713_v33 = vpop.xlane.xlu0 %712 }
 0x1dc   : > { %2471 = vpow2.f32 %v716_v32  ;;  %v715_v34 = vsub.f32 %v2357_v15, %v713_v33  ;;  %v2251_v32 = vld [vmem:[%s2638_s13 + $0x20] sm:$0xff]  ;;  %v2252_v33 = vld [vmem:[%s2638_s13 + $0x28] sm:$0xff] }
 0x1de   : > { %v718_v35 = vmul.f32 1.442695, %v715_v34 }
 0x1e0   : > { %2473 = vpow2.f32 %v718_v35 }
 0x1e9   : > { %v2472_v36 = vpop.eup %2471 }
 0x1ea   : > { %v720_v37 = vsel %vm412_vm2, %v2472_v36, 0.0 }
 0x1eb   : > { %721 = vadd.xlane.f32.xlu1 %v720_v37 }
 0x1ed   : > { %v2624_v38 = vpop.eup %2473 }
 0x1ee   : > { %v723_v39 = vsel %vm416_vm1, %v2624_v38, 0.0 }
 0x1ef   : > { %724 = vadd.xlane.f32.xlu0 %v723_v39 }
 0x1ff   : > { %v431_v47 = vpop.xlane.xlu0 %430 }
 0x201   : > { %v428_v46 = vpop.xlane.xlu1 %427 }
 0x202   : > { %2475 = vrcp.f32 %v428_v46 }
 0x203   : > { %2477 = vrcp.f32 %v431_v47  ;;  %v769_v49 = vpop.permute.xlu0 %768 }
 0x20f   : > { %v2476_v51 = vpop.eup %2475 }
 0x210   : > { %v434_v52 = vmul.f32 %v2476_v51, %v2470_v27  ;;  %v2478_v55 = vpop.eup %2477 }
 0x211   : > { %v435_v57 = vmul.f32 %v2478_v55, %v2614_v25 }
 0x21c   : > { %733 = vxpose.xlu0.b32.start [1/2] (short) (narrow) %v2239_v41, 8 }
 0x21e   : > { %438 = vxpose.xlu1.b32.start [1/2] (short) (narrow) %v436_v42, 8  ;;  %v320_v42 = vld [vmem:[%s2799_s4 + $0x10] sm:$0xff] }
 0x220   : > { %734 = vxpose.xlu0.b32.end [2/2] (short) (narrow) %v2240_v43, 8 }
 0x222   : > { %439 = vxpose.xlu1.b32.end [2/2] (short) (narrow) %v437_v44, 8 }
 0x240   : > { %1216 = vrot.lane.b32.xlu1 %v2566_v1, %s2510_s14 }
 0x244   : > { %1212 = vrot.lane.b32.xlu1 %v2578_v4, %s2510_s14 }
 0x248   : > { %1214 = vrot.lane.b32.xlu1 %v2586_v5, %s2510_s14 }
 0x249   : > { %1218 = vrot.lane.b32.xlu0 %v2564_v0, %s2510_s14 }
 0x274   : > { %v722_v48 = vpop.xlane.xlu1 %721 }
 0x275   : > { %2479 = vrcp.f32 %v722_v48 }
 0x278   : > { %v725_v50 = vpop.xlane.xlu0 %724 }
 0x279   : > { %2481 = vrcp.f32 %v725_v50 }
 0x282   : > { %v2480_v56 = vpop.eup %2479 }
 0x283   : > { %v728_v59 = vmul.f32 %v2480_v56, %v2472_v36 }
 0x286   : > { %v2482_v61 = vpop.eup %2481 }
 0x287   : > { %v729_v62 = vmul.f32 %v2482_v61, %v2624_v38 }
 0x298   : > { %v749_v58 = vpop.trf.xlu0 }
 0x299   : > { %v765_v60 = vmul.f32 %v749_v58, %v728_v59 }
 0x29a   : > { %v454_v53 = vpop.trf.xlu1 }
 0x29b   : > { %v470_v54 = vmul.f32 %v454_v53, %v434_v52 }
 0x29d   : > { %2342 = vmatmul.mubr.msk.f32.vlgmr.msra.gmra.mxu1 %vm412_vm2, %v470_v54 }
 0x29e   : > { %2345 = vmatpush3.msra.mxu1 %v2608_v14  ;;  %2348 = vmatprep.mubr.msk.f32.mxu1 %vm2509_vm3, %v2508_v40 }
 0x29f   : > { %2346 = vmatprep.subr.mxu1 %v2508_v40 }
 0x2a0   : > { %2347 = vmatpush3.msra.mxu1 %v2619_v29 }
 0x2a1   : > { %2358 = vmatprep.subr.mxu1 %v2508_v40  ;;  %2349 = vmatmul.mubr.msk.f32.vlgmr.msra.gmra.mxu1 %vm412_vm2, %v435_v57 }
 0x2a2   : > { %2359 = vmatpush3.msra.mxu1 %v771_v45  ;;  %2362 = vmatprep.mubr.msk.f32.mxu1 %vm2509_vm3, %v2508_v40 }
 0x2a3   : > { %2360 = vmatprep.subr.mxu1 %v2508_v40 }
 0x2a4   : > { %2361 = vmatpush3.msra.mxu1 %v769_v49 }
 0x2a5   : > { %2365 = vmatprep.subr.mxu1 %v2508_v40  ;;  %2363 = vmatmul.mubr.msk.f32.vlgmr.msra.gmra.mxu1 %vm412_vm2, %v765_v60 }
 0x2a6   : > { %2366 = vmatpush3.msra.mxu1 %v771_v45  ;;  %2369 = vmatprep.mubr.msk.f32.mxu1 %vm2509_vm3, %v2508_v40 }
 0x2a7   : > { %2367 = vmatprep.subr.mxu1 %v2508_v40 }
 0x2a8   : > { %2368 = vmatpush3.msra.mxu1 %v769_v49 }
 0x2a9   : > { %2370 = vmatmul.mubr.msk.f32.vlgmr.msra.gmra.mxu1 %vm412_vm2, %v729_v62  ;;  %2377 = vmatprep.subr.mxu1 %v2508_v40 }
 0x2aa   : > { %2379 = vmatprep.mubr.msk.f32.mxu1 %vm2509_vm3, %v2508_v40  ;;  %2378 = vmatpush3.msra.mxu1 %v318_v63 }
 0x2ab   : > { %2387 = vmatprep.subr.mxu1 %v2508_v40 }
 0x2b2   : > { %v1217_v8 = vpop.permute.xlu1 %1216 }
 0x2b6   : > { %v1213_v13 = vpop.permute.xlu1 %1212 }
 0x2ba   : > { %v1215_v17 = vpop.permute.xlu1 %1214 }
 0x2bb   : > { %v1219_v11 = vpop.permute.xlu0 %1218 }
 0x35d   : > { %v540_v3 = vpop.f32.mrf.mxu1 }
 0x35e   : > { %2380 = vmatmul.mubr.msk.f32.vlgmr.msra.gmra.mxu1 %vm324_vm0, %v540_v3 }
 0x35f   : > { %v2343_v6 = vpop.f32.mrf.mxu1  ;;  %2388 = vmatpush3.msra.mxu1 %v318_v63  ;;  %2389 = vmatprep.mubr.msk.f32.mxu1 %vm2509_vm3, %v2508_v40 }
 0x360   : > { %2399 = vmatprep.subr.mxu1 %v2508_v40 }
 0x361   : > { %v613_v7 = vpop.f32.mrf.mxu1 }
 0x362   : > { %2390 = vmatmul.mubr.msk.f32.vlgmr.msra.gmra.mxu1 %vm324_vm0, %v613_v7 }
 0x363   : > { %v2350_v9 = vpop.f32.mrf.mxu1  ;;  %2403 = vmatprep.mubr.msk.f32.mxu1 %vm2509_vm3, %v2508_v40 }
 0x365   : > { %v843_v10 = vpop.f32.mrf.mxu1 }
 0x366   : > { %2375 = vmatmul.mubr.msk.f32.vlgmr.msra.gmra.mxu0 %vm324_vm0, %v843_v10 }
 0x367   : > { %2383 = vmatpush3.msra.mxu0 %v319_v2  ;;  %v2364_v12 = vpop.f32.mrf.mxu1  ;;  %2384 = vmatprep.mubr.msk.f32.mxu0 %vm2509_vm3, %v2508_v40 }
 0x368   : > { %2392 = vmatprep.subr.msk.mxu0 %vm324_vm0, %v1219_v11 }
 0x369   : > { %v916_v15 = vpop.f32.mrf.mxu1 }
 0x36a   : > { %2385 = vmatmul.mubr.msk.f32.vlgmr.msra.gmra.mxu0 %vm324_vm0, %v916_v15 }
 0x36b   : > { %2393 = vmatpush3.xpose.msk.msra.mxu0 %vm324_vm0, %v1219_v11  ;;  %v2371_v16 = vpop.f32.mrf.mxu1  ;;  %2396 = vmatprep.mubr.msk.f32.mxu0 %vm324_vm0, %v1213_v13 }
 0x36c   : > { %2394 = vmatprep.subr.msk.mxu0 %vm324_vm0, %v1217_v8 }
 0x36f   : > { %2395 = vmatpush3.xpose.msk.msra.mxu0 %vm324_vm0, %v1217_v8 }
 0x370   : > { %2413 = vmatprep.subr.mxu0 %v2508_v40 }
 0x372   : > { %2397 = vmatmul.mubr.msk.f32.vlgmr.msra.gmra.mxu0 %vm324_vm0, %v1215_v17 }
 0x373   : > { %2415 = vmatprep.mubr.msk.f32.mxu0 %vm2509_vm3, %v2508_v40  ;;  %2414 = vmatpush3.msra.mxu0 %v320_v42 }
 0x41e   : > { %v1062_v18 = vpop.f32.mrf.mxu1 }
 0x420   : > { %v2381_v19 = vpop.f32.mrf.mxu1 }
 0x422   : > { %v1208_v20 = vpop.f32.mrf.mxu1 }
 0x424   : > { %v2391_v21 = vpop.f32.mrf.mxu1 }
 0x425   : > { %v2261_v21 = vld [vmem:[%s2638_s13 + $0x30] sm:$0xff] }
 0x426   : > { %v989_v22 = vpop.f32.mrf.mxu0 }
 0x427   : > { %v2706_v23 = vadd.f32 %v1062_v18, %v989_v22 }
 0x428   : > { %v2376_v24 = vpop.f32.mrf.mxu0 }
 0x42a   : > { %v1135_v25 = vpop.f32.mrf.mxu0 }
 0x42b   : > { %v2708_v26 = vadd.f32 %v1208_v20, %v1135_v25 }
 0x42c   : > { %v2386_v27 = vpop.f32.mrf.mxu0 }
 0x432   : > { %v2398_v28 = vpop.f32.mrf.mxu0 }
 0x433   : > { %v1306_v41 = vsel %vm416_vm1, %v2398_v28, -inf }
 0x434   : > { %v1294_v30 = vpop.f32.mrf.mxu0 }
 0x435   : > { %v1303_v31 = vsel %vm412_vm2, %v1294_v30, -inf }
 0x436   : > { %1304 = vmax.xlane.f32.xlu0 %v1303_v31 }
 0x44c   : > { %1363 = vrot.lane.b32.xlu0 %v2608_v14, %s2510_s14 }
 0x46a   : > { %1328 = vxpose.xlu0.b32.start [1/2] (short) (narrow) %v2251_v32, 8 }
 0x46e   : > { %1329 = vxpose.xlu0.b32.end [2/2] (short) (narrow) %v2252_v33, 8  ;;  %v321_v33 = vld [vmem:[%s2799_s4 + $0x18] sm:$0xff] }
 0x4bf   : > { %v1305_v34 = vpop.xlane.xlu0 %1304 }
 0x4c0   : > { %v1309_v35 = vsub.f32 %v1294_v30, %v1305_v34 }
 0x4c2   : > { %v1311_v36 = vmul.f32 1.442695, %v1309_v35 }
 0x4c3   : > { %v1364_v37 = vpop.permute.xlu0 %1363 }
 0x4c4   : > { %2483 = vpow2.f32 %v1311_v36  ;;  %2400 = vmatpush3.msra.mxu1 %v1364_v37 }
 0x4c5   : > { %2401 = vmatprep.subr.mxu1 %v2508_v40 }
 0x4d1   : > { %v2484_v38 = vpop.eup %2483 }
 0x4d2   : > { %v1315_v39 = vsel %vm412_vm2, %v2484_v38, 0.0 }
 0x4d3   : > { %1316 = vadd.xlane.f32.xlu1 %v1315_v39 }
 0x4e4   : > { %1361 = vrot.lane.b32.xlu1 %v2619_v29, %s2510_s14 }
 0x4e6   : > { %v1344_v44 = vpop.trf.xlu0 }
 0x4e8   : > { %1667 = vrot.lane.b32.xlu1 %v2564_v0, %s2511_s19 }
 0x4ec   : > { %1665 = vrot.lane.b32.xlu1 %v2566_v1, %s2511_s19 }
 0x4f0   : > { %1661 = vrot.lane.b32.xlu1 %v2578_v4, %s2511_s19 }
 0x4f4   : > { %1663 = vrot.lane.b32.xlu1 %v2586_v5, %s2511_s19 }
 0x518   : > { %1307 = vmax.xlane.f32.xlu1 %v1306_v41 }
 0x55c   : > { %v1317_v43 = vpop.xlane.xlu1 %1316 }
 0x55d   : > { %2485 = vrcp.f32 %v1317_v43 }
 0x560   : > { %v1362_v0 = vpop.permute.xlu1 %1361 }
 0x561   : > { %2402 = vmatpush3.msra.mxu1 %v1362_v0 }
 0x562   : > { %2406 = vmatprep.subr.mxu1 %v2508_v40 }
 0x564   : > { %v1668_v1 = vpop.permute.xlu1 %1667 }
 0x565   : > { %2423 = vmatprep.subr.msk.mxu0 %vm324_vm0, %v1668_v1 }
 0x568   : > { %v1666_v46 = vpop.permute.xlu1 %1665 }
 0x56a   : > { %v2486_v4 = vpop.eup %2485 }
 0x56b   : > { %v1323_v5 = vmul.f32 %v2486_v4, %v2484_v38  ;;  %v2112_v38 = vlaneseq }
 0x56c   : > { %v1662_v47 = vpop.permute.xlu1 %1661 }
 0x56d   : > { %v1360_v45 = vmul.f32 %v1344_v44, %v1323_v5  ;;  %v2113_v39 = vshrl.u32 %v2112_v38, 7 }
 0x56f   : > { %2404 = vmatmul.mubr.msk.f32.vlgmr.msra.gmra.mxu1 %vm412_vm2, %v1360_v45  ;;  %v2114_v41 = vsub.s32 0, %v2113_v39 }
 0x570   : > { %2407 = vmatpush3.msra.mxu1 %v1364_v37  ;;  %2410 = vmatprep.mubr.msk.f32.mxu1 %vm2509_vm3, %v2508_v40  ;;  %v1664_v48 = vpop.permute.xlu1 %1663 }
 0x571   : > { %2408 = vmatprep.subr.mxu1 %v2508_v40 }
 0x572   : > { %2409 = vmatpush3.msra.mxu1 %v1362_v0 }
 0x573   : > { %2418 = vmatprep.subr.mxu1 %v2508_v40 }
 0x5a1   : > { %v1308_v49 = vpop.xlane.xlu1 %1307 }
 0x5a2   : > { %v1310_v50 = vsub.f32 %v2398_v28, %v1308_v49 }
 0x5a4   : > { %v1313_v51 = vmul.f32 1.442695, %v1310_v50 }
 0x5a6   : > { %2487 = vpow2.f32 %v1313_v51 }
 0x5b3   : > { %v2488_v52 = vpop.eup %2487 }
 0x5b4   : > { %v1318_v53 = vsel %vm416_vm1, %v2488_v52, 0.0 }
 0x5b5   : > { %1319 = vadd.xlane.f32.xlu0 %v1318_v53 }
 0x5cb   : > { %1810 = vrot.lane.b32.xlu0 %v2619_v29, %s2511_s19 }
 0x62f   : > { %v1436_v54 = vpop.f32.mrf.mxu1 }
 0x630   : > { %2416 = vmatmul.mubr.msk.f32.vlgmr.msra.gmra.mxu0 %vm324_vm0, %v1436_v54 }
 0x631   : > { %2424 = vmatpush3.xpose.msk.msra.mxu0 %vm324_vm0, %v1668_v1  ;;  %v2405_v55 = vpop.f32.mrf.mxu1  ;;  %2427 = vmatprep.mubr.msk.f32.mxu0 %vm324_vm0, %v1662_v47 }
 0x632   : > { %2425 = vmatprep.subr.msk.mxu0 %vm324_vm0, %v1666_v46 }
 0x635   : > { %2426 = vmatpush3.xpose.msk.msra.mxu0 %vm324_vm0, %v1666_v46 }
 0x636   : > { %2444 = vmatprep.subr.mxu0 %v2508_v40 }
 0x638   : > { %2428 = vmatmul.mubr.msk.f32.vlgmr.msra.gmra.mxu0 %vm324_vm0, %v1664_v48 }
 0x639   : > { %2446 = vmatprep.mubr.msk.f32.mxu0 %vm2509_vm3, %v2508_v40  ;;  %2445 = vmatpush3.msra.mxu0 %v321_v33 }
 0x63e   : > { %v1320_v29 = vpop.xlane.xlu0 %1319 }
 0x63f   : > { %2489 = vrcp.f32 %v1320_v29 }
 0x642   : > { %v1811_v19 = vpop.permute.xlu0 %1810 }
 0x64c   : > { %v2490_v56 = vpop.eup %2489 }
 0x64d   : > { %v1324_v57 = vmul.f32 %v2490_v56, %v2488_v52 }
 0x64f   : > { %2411 = vmatmul.mubr.msk.f32.vlgmr.msra.gmra.mxu1 %vm412_vm2, %v1324_v57 }
 0x650   : > { %2419 = vmatpush3.msra.mxu1 %v320_v42  ;;  %2420 = vmatprep.mubr.msk.f32.mxu1 %vm2509_vm3, %v2508_v40 }
 0x651   : > { %2430 = vmatprep.subr.mxu1 %v2508_v40 }
 0x6f0   : > { %v1582_v58 = vpop.f32.mrf.mxu0 }
 0x6f1   : > { %v2755_v59 = vadd.f32 %v1582_v58, %v2706_v23  ;;  %v2262_v23 = vld [vmem:[%s2638_s13 + $0x38] sm:$0xff] }
 0x6f2   : > { %v2417_v60 = vpop.f32.mrf.mxu0 }
 0x6f8   : > { %v2429_v61 = vpop.f32.mrf.mxu0 }
 0x6f9   : > { %v1755_v2 = vsel %vm416_vm1, %v2429_v61, -inf }
 0x6fa   : > { %v1743_v62 = vpop.f32.mrf.mxu0 }
 0x6fb   : > { %v1752_v63 = vsel %vm412_vm2, %v1743_v62, -inf }
 0x6fc   : > { %1753 = vmax.xlane.f32.xlu1 %v1752_v63 }
 0x700   : > { %1756 = vmax.xlane.f32.xlu1 %v1755_v2 }
 0x70f   : > { %v1509_v3 = vpop.f32.mrf.mxu1 }
 0x710   : > { %2421 = vmatmul.mubr.msk.f32.vlgmr.msra.gmra.mxu1 %vm324_vm0, %v1509_v3 }
 0x711   : > { %v2412_v6 = vpop.f32.mrf.mxu1  ;;  %1812 = vrot.lane.b32.xlu1 %v2608_v14, %s2511_s19  ;;  %2434 = vmatprep.mubr.msk.f32.mxu1 %vm2509_vm3, %v2508_v40 }
 0x785   : > { %v1754_v7 = vpop.xlane.xlu1 %1753 }
 0x786   : > { %v1758_v8 = vsub.f32 %v1743_v62, %v1754_v7 }
 0x788   : > { %v1760_v11 = vmul.f32 1.442695, %v1758_v8 }
 0x789   : > { %v1757_v9 = vpop.xlane.xlu1 %1756 }
 0x78a   : > { %v1759_v10 = vsub.f32 %v2429_v61, %v1757_v9 }
 0x78c   : > { %v1762_v12 = vmul.f32 1.442695, %v1759_v10 }
 0x78d   : > { %v1813_v13 = vpop.permute.xlu1 %1812 }
 0x78e   : > { %2491 = vpow2.f32 %v1762_v12  ;;  %2431 = vmatpush3.msra.mxu1 %v1813_v13 }
 0x78f   : > { %2432 = vmatprep.subr.mxu1 %v2508_v40  ;;  %2493 = vpow2.f32 %v1760_v11 }
 0x790   : > { %2433 = vmatpush3.msra.mxu1 %v1811_v19 }
 0x791   : > { %2437 = vmatprep.subr.mxu1 %v2508_v40 }
 0x79b   : > { %v2492_v15 = vpop.eup %2491 }
 0x79c   : > { %v1767_v14 = vsel %vm416_vm1, %v2492_v15, 0.0  ;;  %v2494_v16 = vpop.eup %2493 }
 0x79d   : > { %1768 = vadd.xlane.f32.xlu1 %v1767_v14  ;;  %v1764_v17 = vsel %vm412_vm2, %v2494_v16, 0.0 }
 0x7a1   : > { %1765 = vadd.xlane.f32.xlu1 %v1764_v17 }
 0x7d0   : > { %v1656_v18 = vpop.f32.mrf.mxu1 }
 0x7d1   : > { %v1660_v20 = vadd.f32 %v1656_v18, %v2708_v26 }
 0x7d2   : > { %v2422_v22 = vpop.f32.mrf.mxu1 }
 0x7d4   : > { %1777 = vxpose.xlu1.b32.start [1/2] (short) (narrow) %v2261_v21, 8 }
 0x7d8   : > { %1778 = vxpose.xlu1.b32.end [2/2] (short) (narrow) %v2262_v23, 8 }
 0x826   : > { %v1769_v24 = vpop.xlane.xlu1 %1768 }
 0x82a   : > { %v1766_v25 = vpop.xlane.xlu1 %1765 }
 0x82b   : > { %2495 = vrcp.f32 %v1766_v25 }
 0x82c   : > { %2497 = vrcp.f32 %v1769_v24 }
 0x838   : > { %v2496_v27 = vpop.eup %2495 }
 0x839   : > { %v1772_v28 = vmul.f32 %v2496_v27, %v2494_v16  ;;  %v2498_v32 = vpop.eup %2497 }
 0x83a   : > { %v1773_v26 = vmul.f32 %v2498_v32, %v2492_v15 }
 0x850   : > { %v1793_v30 = vpop.trf.xlu1 }
 0x851   : > { %v1809_v31 = vmul.f32 %v1793_v30, %v1772_v28 }
 0x853   : > { %2435 = vmatmul.mubr.msk.f32.vlgmr.msra.gmra.mxu1 %vm412_vm2, %v1809_v31 }
 0x854   : > { %2438 = vmatpush3.msra.mxu1 %v1813_v13  ;;  %2441 = vmatprep.mubr.msk.f32.mxu1 %vm2509_vm3, %v2508_v40 }
 0x855   : > { %2439 = vmatprep.subr.mxu1 %v2508_v40 }
 0x856   : > { %2440 = vmatpush3.msra.mxu1 %v1811_v19 }
 0x857   : > { %2442 = vmatmul.mubr.msk.f32.vlgmr.msra.gmra.mxu1 %vm412_vm2, %v1773_v26  ;;  %2449 = vmatprep.subr.mxu1 %v2508_v40 }
 0x858   : > { %2451 = vmatprep.mubr.msk.f32.mxu1 %vm2509_vm3, %v2508_v40  ;;  %2450 = vmatpush3.msra.mxu1 %v321_v33  ;;  %v2110_v40 = vld [vmem:[%s2800_s5] sm:$0x1] }
 0x859   : > { %v2115_v42 = vrot.slane %v2110_v40, %v2114_v41 }
 0x913   : > { %v1885_v34 = vpop.f32.mrf.mxu1 }
 0x914   : > { %2447 = vmatmul.mubr.msk.f32.vlgmr.msra.gmra.mxu0 %vm324_vm0, %v1885_v34 }
 0x915   : > { %v2436_v35 = vpop.f32.mrf.mxu1 }
 0x917   : > { %v1958_v36 = vpop.f32.mrf.mxu1 }
 0x918   : > { %2452 = vmatmul.mubr.msk.f32.vlgmr.msra.gmra.mxu1 %vm324_vm0, %v1958_v36 }
 0x919   : > { %v2443_v37 = vpop.f32.mrf.mxu1 }
 0x9d4   : > { %v2031_v43 = vpop.f32.mrf.mxu0 }
 0x9d5   : > { %v2035_v0 = vadd.f32 %v2031_v43, %v2755_v59 }
 0x9d6   : > { %v2448_v1 = vpop.f32.mrf.mxu0 }
 0x9d7   : > { %v2117_v4 = vadd.f32 %v2115_v42, %v2035_v0 }
 0x9d8   : > { %v2105_v44 = vpop.f32.mrf.mxu1 }
 0x9d9   : > { %2119 = vst.msk [vmem:[%s311_s30] sm:$0xff] %vm2118_vm4, %v2117_v4  ;;  %v2109_v5 = vadd.f32 %v2105_v44, %v1660_v20 }
 0x9da   : > { %v2453_v45 = vpop.f32.mrf.mxu1 }
 0x9db   : > { %v2120_v46 = vadd.f32 %v2110_v40, %v2109_v5 }
 0x9dd   : > { %2122 = vst.msk [vmem:[%s311_s30 + $0x8] sm:$0x1] %vm2121_vm5, %v2120_v46 }
 0x9de PF: > { %s16_s21 = sadd.s32 1, %s2505_s21  }
 0x9df   : > { %p13_p4 = scmp.ge.s32.totalorder %s16_s21, 4  }
 0x9e1   :  { %15 = sbr.rel (!%p13_p4) target bundleno = 1 (0x1), region = 86 }

</bundles_post_ra>
